<compile_context>
chip_gen: v5e
topology: v5e:2x2
jax: 0.10.0
libtpu: 0.0.40
codegen_flags: <defaults>
</compile_context>

<pallas_src>
import functools
import math

import jax
import jax.numpy as jnp
from jax import lax
from jax.experimental import pallas as pl
from jax.experimental.pallas import tpu as pltpu


# ----------------------- per-chip tiling / VMEM budget -----------------------

def _detect_vmem_capacity():
    try:
        cap = int(pltpu.get_tpu_info().vmem_capacity_bytes)
        if cap >= 16 * 1024 * 1024:
            return cap
    except Exception:
        pass
    return 64 * 1024 * 1024          # conservative default (v7x-sized)


_VMEM_CAP = _detect_vmem_capacity()
_VMEM_LIMIT = max(32 * 1024 * 1024,
                  min(_VMEM_CAP - 24 * 1024 * 1024, 100 * 1024 * 1024))
_BIG_VMEM = _VMEM_CAP >= 100 * 1024 * 1024

if _BIG_VMEM:                        # v5e / v6e: 128 MiB VMEM -> bigger tiles
    _TM, _TN, _FF_TN, _TK = 512, 512, 512, 2048
    _ATT_TQ, _ATT_TKV = 256, 1024
else:                                # v7x: 64 MiB VMEM -> smaller tiles
    _TM, _TN, _FF_TN, _TK = 256, 256, 128, 1024
    _ATT_TQ, _ATT_TKV = 256, 512


def _pick_tile(dim, desired, aligns=(128, 8)):
    """Full dim if it already fits, else the largest aligned divisor <= desired."""
    if dim <= desired:
        return dim
    for align in aligns:
        t = (min(desired, dim) // align) * align
        while t >= align:
            if dim % t == 0:
                return t
            t -= align
    return dim


# ------------------------------- Pallas kernels ------------------------------

def _rmsnorm_kernel(x_ref, g_ref, o_ref, *, eps):
    x = x_ref[...]
    ms = jnp.mean(x * x, axis=-1, keepdims=True)
    o_ref[...] = x * jax.lax.rsqrt(ms + eps) * g_ref[...]


def rmsnorm(x, g, *, eps):
    M, D = x.shape
    tm = _pick_tile(M, _TM, (128, 8))
    return pl.pallas_call(
        functools.partial(_rmsnorm_kernel, eps=eps),
        out_shape=jax.ShapeDtypeStruct((M, D), jnp.float32),
        grid=(M // tm,),
        in_specs=[pl.BlockSpec((tm, D), lambda i: (i, 0)),
                  pl.BlockSpec((1, D), lambda i: (0, 0))],
        out_specs=pl.BlockSpec((tm, D), lambda i: (i, 0)),
        compiler_params=pltpu.CompilerParams(
            dimension_semantics=("parallel",), vmem_limit_bytes=_VMEM_LIMIT),
    )(x, g)


def _norm_matmul_kernel(x_ref, g_ref, w_ref, o_ref, xn_ref, *, eps):
    # RMSNorm of the (tm, D) row block is computed once per row tile (j == 0), cast to
    # bf16 and kept resident in VMEM so the MXU gets bf16 operands for every N tile.
    @pl.when(pl.program_id(1) == 0)
    def _():
        x = x_ref[...]
        ms = jnp.mean(x * x, axis=-1, keepdims=True)
        xn_ref[...] = (x * jax.lax.rsqrt(ms + eps) * g_ref[...]).astype(jnp.bfloat16)

    o_ref[...] = jnp.dot(xn_ref[...], w_ref[...],
                         preferred_element_type=jnp.float32).astype(o_ref.dtype)


def norm_matmul(x, g, w, *, eps):
    """out = rmsnorm(x, g) @ w   (w pre-transposed (in, out) bf16; output bf16)."""
    M, D = x.shape
    N = w.shape[1]
    tm = _pick_tile(M, _TM, (128, 8))
    tn = _pick_tile(N, _TN, (128,))
    return pl.pallas_call(
        functools.partial(_norm_matmul_kernel, eps=eps),
        out_shape=jax.ShapeDtypeStruct((M, N), jnp.bfloat16),
        grid=(M // tm, N // tn),
        in_specs=[pl.BlockSpec((tm, D), lambda i, j: (i, 0)),
                  pl.BlockSpec((1, D), lambda i, j: (0, 0)),
                  pl.BlockSpec((D, tn), lambda i, j: (0, j))],
        out_specs=pl.BlockSpec((tm, tn), lambda i, j: (i, j)),
        scratch_shapes=[pltpu.VMEM((tm, D), jnp.bfloat16)],
        compiler_params=pltpu.CompilerParams(
            dimension_semantics=("parallel", "arbitrary"),
            vmem_limit_bytes=_VMEM_LIMIT),
    )(x, g, w)


def _norm_swiglu_kernel(x_ref, g_ref, w1_ref, w3_ref, o_ref, xn_ref, *, eps, activation):
    @pl.when(pl.program_id(1) == 0)
    def _():
        x = x_ref[...]
        ms = jnp.mean(x * x, axis=-1, keepdims=True)
        xn_ref[...] = (x * jax.lax.rsqrt(ms + eps) * g_ref[...]).astype(jnp.bfloat16)

    xn = xn_ref[...]
    h1 = jnp.dot(xn, w1_ref[...], preferred_element_type=jnp.float32)
    h3 = jnp.dot(xn, w3_ref[...], preferred_element_type=jnp.float32)
    if activation == "silu":
        gate = h1 * jax.nn.sigmoid(h1)
    elif activation == "tanh":
        gate = jnp.tanh(h1)
    else:
        raise ValueError("incorrect activation selection")
    o_ref[...] = (gate * h3).astype(o_ref.dtype)


def norm_swiglu(x, g, w1, w3, *, eps, activation):
    """out = act(rmsnorm(x) @ w1) * (rmsnorm(x) @ w3), emitted bf16 for the down proj."""
    M, D = x.shape
    N = w1.shape[1]
    tm = _pick_tile(M, _TM, (128, 8))
    tn = _pick_tile(N, _FF_TN, (128,))
    return pl.pallas_call(
        functools.partial(_norm_swiglu_kernel, eps=eps, activation=activation),
        out_shape=jax.ShapeDtypeStruct((M, N), jnp.bfloat16),
        grid=(M // tm, N // tn),
        in_specs=[pl.BlockSpec((tm, D), lambda i, j: (i, 0)),
                  pl.BlockSpec((1, D), lambda i, j: (0, 0)),
                  pl.BlockSpec((D, tn), lambda i, j: (0, j)),
                  pl.BlockSpec((D, tn), lambda i, j: (0, j))],
        out_specs=pl.BlockSpec((tm, tn), lambda i, j: (i, j)),
        scratch_shapes=[pltpu.VMEM((tm, D), jnp.bfloat16)],
        compiler_params=pltpu.CompilerParams(
            dimension_semantics=("parallel", "arbitrary"),
            vmem_limit_bytes=_VMEM_LIMIT),
    )(x, g, w1, w3)


def _matmul_residual_kernel(a_ref, w_ref, r_ref, o_ref, acc_ref):
    @pl.when(pl.program_id(2) == 0)
    def _():
        acc_ref[...] = jnp.zeros_like(acc_ref)

    acc_ref[...] += jnp.dot(a_ref[...], w_ref[...], preferred_element_type=jnp.float32)

    @pl.when(pl.program_id(2) == pl.num_programs(2) - 1)
    def _():
        o_ref[...] = acc_ref[...] + r_ref[...]


def matmul_residual(a, w, r):
    """out = r + a @ w  with a K-tiled f32 accumulator (residual stream stays f32)."""
    M, K = a.shape
    N = w.shape[1]
    tm = _pick_tile(M, _TM, (128, 8))
    tn = _pick_tile(N, _TN, (128,))
    tk = _pick_tile(K, _TK, (128,))
    return pl.pallas_call(
        _matmul_residual_kernel,
        out_shape=jax.ShapeDtypeStruct((M, N), jnp.float32),
        grid=(M // tm, N // tn, K // tk),
        in_specs=[pl.BlockSpec((tm, tk), lambda i, j, k: (i, k)),
                  pl.BlockSpec((tk, tn), lambda i, j, k: (k, j)),
                  pl.BlockSpec((tm, tn), lambda i, j, k: (i, j))],
        out_specs=pl.BlockSpec((tm, tn), lambda i, j, k: (i, j)),
        scratch_shapes=[pltpu.VMEM((tm, tn), jnp.float32)],
        compiler_params=pltpu.CompilerParams(
            dimension_semantics=("parallel", "parallel", "arbitrary"),
            vmem_limit_bytes=_VMEM_LIMIT),
    )(a, w, r)


_NEG_INIT = -1.0e30   # finite init for the running max (masked scores use -inf)


def _flash_attention_kernel(q_ref, k_ref, v_ref, cq_ref, sq_ref, ck_ref, sk_ref,
                            o_ref, m_sc, l_sc, acc_sc, *,
                            scale, mask_mode, band_buffer):
    # q: (1, tq, H*Dh) bf16; k/v: (1, tkv, KvH*Dh) bf16 (un-roped, straight from the
    # projection).  cq/sq/ck/sk: (rows, Dh) f32 in duplicated rotate-half layout
    # ([cos,cos], [-sin,sin]).  Online softmax over the kv grid axis; mask built from
    # iota per tile; GQA handled by a static per-head loop (kv head g = h // n_rep).
    qi = pl.program_id(1)
    ki = pl.program_id(2)
    tq = q_ref.shape[1]
    tkv = k_ref.shape[1]
    dh = cq_ref.shape[-1]
    half = dh // 2
    n_heads = q_ref.shape[-1] // dh
    n_kv = k_ref.shape[-1] // dh
    n_rep = n_heads // n_kv

    @pl.when(ki == 0)
    def _():
        m_sc[...] = jnp.full(m_sc.shape, _NEG_INIT, jnp.float32)
        l_sc[...] = jnp.zeros(l_sc.shape, jnp.float32)
        acc_sc[...] = jnp.zeros(acc_sc.shape, jnp.float32)

    if mask_mode == "none":
        masked = None
    else:
        row = lax.broadcasted_iota(jnp.int32, (tq, tkv), 0) + qi * tq
        col = lax.broadcasted_iota(jnp.int32, (tq, tkv), 1) + ki * tkv
        if mask_mode == "causal":
            masked = col > row
        elif mask_mode == "self":
            masked = col == row
        elif mask_mode == "band":
            masked = jnp.abs(col - row) <= band_buffer
        else:
            raise ValueError("unknown mask mode")

    def rope(x, c, s):
        # x: (rows, Dh) f32 in rotate-half layout; c = [cos,cos], s = [-sin,sin].
        xr = jnp.concatenate([x[:, half:], x[:, :half]], axis=-1)
        return x * c + xr * s

    cq = cq_ref[...]
    sq = sq_ref[...]
    ck = ck_ref[...]
    sk = sk_ref[...]

    for g in range(n_kv):
        kg = rope(k_ref[0, :, g * dh:(g + 1) * dh].astype(jnp.float32),
                  ck, sk).astype(jnp.bfloat16)
        vg = v_ref[0, :, g * dh:(g + 1) * dh]
        for r in range(n_rep):
            h = g * n_rep + r
            qh = (rope(q_ref[0, :, h * dh:(h + 1) * dh].astype(jnp.float32), cq, sq)
                  * scale).astype(jnp.bfloat16)
            scores = lax.dot_general(qh, kg, (((1,), (1,)), ((), ())),
                                     preferred_element_type=jnp.float32)   # (tq, tkv)
            if masked is not None:
                scores = jnp.where(masked, -jnp.inf, scores)
            m_prev = m_sc[:, h:h + 1]
            m_new = jnp.maximum(m_prev, jnp.max(scores, axis=-1, keepdims=True))
            alpha = jnp.exp(m_prev - m_new)
            p = jnp.exp(scores - m_new)
            l_sc[:, h:h + 1] = alpha * l_sc[:, h:h + 1] + jnp.sum(p, axis=-1, keepdims=True)
            acc_sc[:, h * dh:(h + 1) * dh] = (
                alpha * acc_sc[:, h * dh:(h + 1) * dh]
                + jnp.dot(p.astype(jnp.bfloat16), vg, preferred_element_type=jnp.float32))
            m_sc[:, h:h + 1] = m_new

    @pl.when(ki == pl.num_programs(2) - 1)
    def _():
        for h in range(n_heads):
            inv = 1.0 / l_sc[:, h:h + 1]
            o_ref[0, :, h * dh:(h + 1) * dh] = (
                acc_sc[:, h * dh:(h + 1) * dh] * inv).astype(o_ref.dtype)


def attention(q, k, v, cos_f, sin_f, *, scale, mask_mode, band_buffer):
    """Flash-style GQA attention with fused RoPE and in-kernel mask.

    q: (B, S, H*Dh) bf16, k/v: (B, S, KvH*Dh) bf16, cos_f/sin_f: (S, Dh) f32.
    Returns (B, S, H*Dh) bf16 (directly consumable by the wo projection)."""
    B, S, NQ = q.shape
    NKV = k.shape[-1]
    Dh = cos_f.shape[-1]
    n_heads = NQ // Dh
    tq = _pick_tile(S, _ATT_TQ, (128, 8))
    tkv = _pick_tile(S, _ATT_TKV, (128, 8))
    kern = functools.partial(_flash_attention_kernel, scale=scale,
                             mask_mode=mask_mode, band_buffer=band_buffer)
    return pl.pallas_call(
        kern,
        out_shape=jax.ShapeDtypeStruct((B, S, NQ), jnp.bfloat16),
        grid=(B, S // tq, S // tkv),
        in_specs=[
            pl.BlockSpec((1, tq, NQ), lambda b, i, j: (b, i, 0)),
            pl.BlockSpec((1, tkv, NKV), lambda b, i, j: (b, j, 0)),
            pl.BlockSpec((1, tkv, NKV), lambda b, i, j: (b, j, 0)),
            pl.BlockSpec((tq, Dh), lambda b, i, j: (i, 0)),
            pl.BlockSpec((tq, Dh), lambda b, i, j: (i, 0)),
            pl.BlockSpec((tkv, Dh), lambda b, i, j: (j, 0)),
            pl.BlockSpec((tkv, Dh), lambda b, i, j: (j, 0)),
        ],
        out_specs=pl.BlockSpec((1, tq, NQ), lambda b, i, j: (b, i, 0)),
        scratch_shapes=[
            pltpu.VMEM((tq, n_heads), jnp.float32),   # running max m
            pltpu.VMEM((tq, n_heads), jnp.float32),   # running denom l
            pltpu.VMEM((tq, NQ), jnp.float32),        # running numerator acc
        ],
        compiler_params=pltpu.CompilerParams(
            dimension_semantics=("parallel", "parallel", "arbitrary"),
            vmem_limit_bytes=_VMEM_LIMIT),
    )(q, k, v, cos_f, sin_f, cos_f, sin_f)


# --------------------------------- JAX glue ----------------------------------

def precompute_freqs(head_dim, end, theta):
    freqs = 1.0 / theta ** (jnp.arange(0, head_dim, 2)[: head_dim // 2]
                            .astype(jnp.float32) / head_dim)
    t = jnp.arange(end, dtype=jnp.float32)
    freqs = jnp.outer(t, freqs)                     # (end, head_dim//2)
    return jnp.cos(freqs), jnp.sin(freqs)           # polar(1, f) = cos + i sin


def _rope_perm(n_heads, head_dim):
    # Within each head, reorder output columns to [even dims..., odd dims...] so the
    # interleaved complex RoPE becomes a contiguous rotate-half.  q.k scores are invariant
    # because q and k get the same permutation.
    within = jnp.concatenate([jnp.arange(0, head_dim, 2), jnp.arange(1, head_dim, 2)])
    return (jnp.arange(n_heads)[:, None] * head_dim + within[None, :]).reshape(-1)


def init_params(key, cfg):
    D, H = cfg["dim"], cfg["n_heads"]
    KvH = cfg["n_kv_heads"] or H
    Dh = D // H
    hidden = int(2 * (4 * D) / 3)
    if cfg.get("ffn_dim_multiplier") is not None:
        hidden = int(cfg["ffn_dim_multiplier"] * hidden)
    m = cfg["multiple_of"]
    hidden = m * ((hidden + m - 1) // m)

    perm_q = _rope_perm(H, Dh)
    perm_k = _rope_perm(KvH, Dh)

    layers = []
    for _ in range(cfg["n_layers"]):
        key, *ks = jax.random.split(key, 8)
        wq = 0.02 * jax.random.normal(ks[0], (H * Dh, D), jnp.float32)     # torch (out, in)
        wk = 0.02 * jax.random.normal(ks[1], (KvH * Dh, D), jnp.float32)
        wv = 0.02 * jax.random.normal(ks[2], (KvH * Dh, D), jnp.float32)
        wo = 0.02 * jax.random.normal(ks[3], (D, H * Dh), jnp.float32)
        w1 = 0.02 * jax.random.normal(ks[4], (hidden, D), jnp.float32)
        w2 = 0.02 * jax.random.normal(ks[5], (D, hidden), jnp.float32)
        w3 = 0.02 * jax.random.normal(ks[6], (hidden, D), jnp.float32)
        # Pre-transpose to (in, out), permute q/k columns for rotate-half RoPE, fuse
        # Q|K|V into one matrix (single fused rmsnorm+matmul kernel), store bf16.
        wqkv_t = jnp.concatenate([wq.T[:, perm_q], wk.T[:, perm_k], wv.T], axis=1)
        layers.append(dict(
            wqkv=wqkv_t.astype(jnp.bfloat16),
            wo=wo.T.astype(jnp.bfloat16),
            w1=w1.T.astype(jnp.bfloat16),
            w3=w3.T.astype(jnp.bfloat16),
            w2=w2.T.astype(jnp.bfloat16),
            attn_norm=jnp.ones((1, D), jnp.float32),
            ffn_norm=jnp.ones((1, D), jnp.float32),
        ))
    cos, sin = precompute_freqs(Dh, cfg["max_seq_len"] * 2, cfg["rope_theta"])
    return dict(layers=layers, final_norm=jnp.ones((1, D), jnp.float32),
                rope_cos=cos, rope_sin=sin)


def transformer_forward(params, x, start_pos, cfg, *, causal_mask_bool=False,
                        self_mask=True, diag_mask_buffer_tokens=None):
    """Default Transformer.forward path: self_mask=True, causal_mask_bool=False,
    attention_dropout=0, return_attW=False."""
    # TODO(synk): persistent cross-call KV cache (start_pos > 0 incremental decode),
    # attention_dropout (randperm-based) and the return_attW path are not implemented.
    assert start_pos == 0, "only the prefill path (start_pos == 0) is implemented"
    B, S, D = x.shape
    H = cfg["n_heads"]
    KvH = cfg["n_kv_heads"] or H
    Dh = D // H
    eps = cfg["norm_eps"]
    scale = 1.0 / math.sqrt(Dh)
    M = B * S
    nq, nk = H * Dh, KvH * Dh

    # RoPE tables in duplicated rotate-half layout: C = [cos, cos], S = [-sin, sin].
    c = params["rope_cos"][start_pos:start_pos + S]
    s = params["rope_sin"][start_pos:start_pos + S]
    cos_f = jnp.concatenate([c, c], axis=-1)
    sin_f = jnp.concatenate([-s, s], axis=-1)

    # Mask selection mirrors the module; the predicate itself is built inside the kernel.
    if S > 1 and causal_mask_bool:
        mask_mode, band = "causal", 0
    elif S > 1 and self_mask:
        if diag_mask_buffer_tokens is None:
            mask_mode, band = "self", 0
        else:
            mask_mode, band = "band", int(diag_mask_buffer_tokens)
    else:
        mask_mode, band = "none", 0

    h = x.astype(jnp.float32).reshape(M, D)
    for layer in params["layers"]:
        # ---- attention block: fused rmsnorm + (Q|K|V) projection (bf16 out) ----
        qkv = norm_matmul(h, layer["attn_norm"], layer["wqkv"], eps=eps)
        xq = qkv[:, :nq].reshape(B, S, nq)
        xk = qkv[:, nq:nq + nk].reshape(B, S, nk)
        xv = qkv[:, nq + nk:].reshape(B, S, nk)
        # Flash attention with fused RoPE + mask; output already (B, S, H*Dh) bf16.
        att = attention(xq, xk, xv, cos_f, sin_f, scale=scale,
                        mask_mode=mask_mode, band_buffer=band)
        h = matmul_residual(att.reshape(M, nq), layer["wo"], h)     # wo proj + residual

        # ---- feed-forward: fused rmsnorm + SwiGLU up/gate, then down proj + residual ----
        gate = norm_swiglu(h, layer["ffn_norm"], layer["w1"], layer["w3"],
                           eps=eps, activation=cfg.get("activation", "silu"))
        h = matmul_residual(gate, layer["w2"], h)

    out = rmsnorm(h, params["final_norm"], eps=eps)
    return out.reshape(B, S, D)


# ----------------------------------- main -------------------------------------

if __name__ == "__main__":
    cfg = dict(dim=32, n_layers=2, n_heads=4, n_kv_heads=2, norm_eps=1e-5,
               rope_theta=500000.0, max_seq_len=16, multiple_of=32,
               ffn_dim_multiplier=None, activation="silu")

    key = jax.random.PRNGKey(0)
    kx, kp = jax.random.split(key)
    params = init_params(kp, cfg)

    # h_in_vae: (batch=2, seq=8, dim=32)
    x = jax.random.normal(kx, (2, 8, cfg["dim"]), jnp.float32)

    fwd = jax.jit(functools.partial(transformer_forward, start_pos=0, cfg=cfg))
    out = fwd(params, x)
    jax.block_until_ready(out)
    assert out.shape == x.shape and out.dtype == jnp.float32
    assert bool(jnp.all(jnp.isfinite(out)))
    print("KERNEL_OK")
</pallas_src>

<mosaic_0001>
module attributes {stable_mosaic.version = 11 : i64} {
  func.func @_norm_matmul_kernel(%arg0: i32, %arg1: i32, %arg2: memref<16x32xf32, #tpu.memory_space<vmem>>, %arg3: memref<1x32xf32, #tpu.memory_space<vmem>>, %arg4: memref<32x64xbf16, #tpu.memory_space<vmem>>, %arg5: memref<16x64xbf16, #tpu.memory_space<vmem>>, %arg6: memref<16x32xbf16, #tpu.memory_space<vmem>>) attributes {dimension_semantics = [#tpu.dimension_semantics<parallel>, #tpu.dimension_semantics<arbitrary>], iteration_bounds = array<i64: 1, 1>, scalar_prefetch = 0 : i64, scratch_operands = 1 : i64, tpu.core_type = #tpu.core_type<tc>, window_params = [{transform_indices = @transform_0, window_bounds = array<i64: 16, 32>}, {pipeline_mode = #tpu.pipeline_mode<synchronous>, transform_indices = @transform_1, window_bounds = array<i64: 1, 32>}, {transform_indices = @transform_2, window_bounds = array<i64: 32, 64>}, {transform_indices = @transform_3, window_bounds = array<i64: 16, 64>}]} {
    %c0_i32 = arith.constant 0 : i32
    %0 = arith.cmpi eq, %arg1, %c0_i32 : i32
    %1 = arith.extui %0 : i1 to i32
    %c0_i32_0 = arith.constant 0 : i32
    %2 = arith.cmpi ne, %1, %c0_i32_0 : i32
    scf.if %2 {
      %c0_6 = arith.constant 0 : index
      %c0_7 = arith.constant 0 : index
      %8 = vector.load %arg2[%c0_6, %c0_7] : memref<16x32xf32, #tpu.memory_space<vmem>>, vector<16x32xf32>
      %9 = arith.mulf %8, %8 : vector<16x32xf32>
      %cst_8 = arith.constant dense<0.000000e+00> : vector<16xf32>
      %10 = vector.multi_reduction <add>, %9, %cst_8 [1] : vector<16x32xf32> to vector<16xf32>
      %11 = vector.shape_cast %10 : vector<16xf32> to vector<16x1xf32>
      %cst_9 = arith.constant 3.200000e+01 : f32
      %12 = vector.broadcast %cst_9 : f32 to vector<16x1xf32>
      %13 = arith.divf %11, %12 : vector<16x1xf32>
      %cst_10 = arith.constant 9.99999974E-6 : f32
      %14 = vector.broadcast %cst_10 : f32 to vector<16x1xf32>
      %15 = arith.addf %13, %14 : vector<16x1xf32>
      %16 = math.rsqrt %15 : vector<16x1xf32>
      %17 = vector.broadcast %16 : vector<16x1xf32> to vector<16x32xf32>
      %18 = arith.mulf %8, %17 : vector<16x32xf32>
      %c0_11 = arith.constant 0 : index
      %c0_12 = arith.constant 0 : index
      %19 = vector.load %arg3[%c0_11, %c0_12] : memref<1x32xf32, #tpu.memory_space<vmem>>, vector<1x32xf32>
      %20 = vector.broadcast %19 : vector<1x32xf32> to vector<16x32xf32>
      %21 = arith.mulf %18, %20 : vector<16x32xf32>
      %22 = arith.truncf %21 : vector<16x32xf32> to vector<16x32xbf16>
      %c0_13 = arith.constant 0 : index
      %c0_14 = arith.constant 0 : index
      %23 = vector.load %arg6[%c0_13, %c0_14] : memref<16x32xbf16, #tpu.memory_space<vmem>>, vector<16x32xbf16>
      tpu.vector_store %arg6[%c0_13, %c0_14], %22 {strides = array<i32>} : memref<16x32xbf16, #tpu.memory_space<vmem>>, vector<16x32xbf16>,
    } else {
    }
    %c0 = arith.constant 0 : index
    %c0_1 = arith.constant 0 : index
    %3 = vector.load %arg6[%c0, %c0_1] : memref<16x32xbf16, #tpu.memory_space<vmem>>, vector<16x32xbf16>
    %c0_2 = arith.constant 0 : index
    %c0_3 = arith.constant 0 : index
    %4 = vector.load %arg4[%c0_2, %c0_3] : memref<32x64xbf16, #tpu.memory_space<vmem>>, vector<32x64xbf16>
    %cst = arith.constant dense<0.000000e+00> : vector<16x64xf32>
    %5 = tpu.matmul %3, %4, %cst {dimension_numbers = #tpu.dot_dimension_numbers<[1], [0], [0], [1], [0, 0, 1, 1], [], []>} : vector<16x32xbf16>, vector<32x64xbf16>, vector<16x64xf32> -> vector<16x64xf32>
    %6 = arith.truncf %5 : vector<16x64xf32> to vector<16x64xbf16>
    %c0_4 = arith.constant 0 : index
    %c0_5 = arith.constant 0 : index
    %7 = vector.load %arg5[%c0_4, %c0_5] : memref<16x64xbf16, #tpu.memory_space<vmem>>, vector<16x64xbf16>
    tpu.vector_store %arg5[%c0_4, %c0_5], %6 {strides = array<i32>} : memref<16x64xbf16, #tpu.memory_space<vmem>>, vector<16x64xbf16>,
    return
  }
  func.func @transform_0(%arg0: i32, %arg1: i32) -> (i32, i32) {
    %c0_i32 = arith.constant 0 : i32
    %c0_i32_0 = arith.constant 0 : i32
    return %arg0, %c0_i32 : i32, i32
  }
  func.func @transform_1(%arg0: i32, %arg1: i32) -> (i32, i32) {
    %c0_i32 = arith.constant 0 : i32
    %c0_i32_0 = arith.constant 0 : i32
    %c0_i32_1 = arith.constant 0 : i32
    return %c0_i32, %c0_i32_0 : i32, i32
  }
  func.func @transform_2(%arg0: i32, %arg1: i32) -> (i32, i32) {
    %c0_i32 = arith.constant 0 : i32
    %c0_i32_0 = arith.constant 0 : i32
    return %c0_i32, %arg1 : i32, i32
  }
  func.func @transform_3(%arg0: i32, %arg1: i32) -> (i32, i32) {
    %c0_i32 = arith.constant 0 : i32
    return %arg0, %arg1 : i32, i32
  }
}

module attributes {stable_mosaic.version = 11 : i64} {
  func.func @_matmul_residual_kernel(%arg0: i32, %arg1: i32, %arg2: i32, %arg3: memref<16x32xbf16, #tpu.memory_space<vmem>>, %arg4: memref<32x32xbf16, #tpu.memory_space<vmem>>, %arg5: memref<16x32xf32, #tpu.memory_space<vmem>>, %arg6: memref<16x32xf32, #tpu.memory_space<vmem>>, %arg7: memref<16x32xf32, #tpu.memory_space<vmem>>) attributes {dimension_semantics = [#tpu.dimension_semantics<parallel>, #tpu.dimension_semantics<parallel>, #tpu.dimension_semantics<arbitrary>], iteration_bounds = array<i64: 1, 1, 1>, scalar_prefetch = 0 : i64, scratch_operands = 1 : i64, tpu.core_type = #tpu.core_type<tc>, window_params = [{transform_indices = @transform_0, window_bounds = array<i64: 16, 32>}, {transform_indices = @transform_1, window_bounds = array<i64: 32, 32>}, {transform_indices = @transform_2, window_bounds = array<i64: 16, 32>}, {transform_indices = @transform_3, window_bounds = array<i64: 16, 32>}]} {
    %c0_i32 = arith.constant 0 : i32
    %0 = arith.cmpi eq, %arg2, %c0_i32 : i32
    %1 = arith.extui %0 : i1 to i32
    %c0_i32_0 = arith.constant 0 : i32
    %2 = arith.cmpi ne, %1, %c0_i32_0 : i32
    scf.if %2 {
      %cst_10 = arith.constant 0.000000e+00 : f32
      %12 = vector.broadcast %cst_10 : f32 to vector<16x32xf32>
      %c0_11 = arith.constant 0 : index
      %c0_12 = arith.constant 0 : index
      %13 = vector.load %arg7[%c0_11, %c0_12] : memref<16x32xf32, #tpu.memory_space<vmem>>, vector<16x32xf32>
      tpu.vector_store %arg7[%c0_11, %c0_12], %12 {strides = array<i32>} : memref<16x32xf32, #tpu.memory_space<vmem>>, vector<16x32xf32>,
    } else {
    }
    %c0 = arith.constant 0 : index
    %c0_1 = arith.constant 0 : index
    %3 = vector.load %arg7[%c0, %c0_1] : memref<16x32xf32, #tpu.memory_space<vmem>>, vector<16x32xf32>
    %c0_2 = arith.constant 0 : index
    %c0_3 = arith.constant 0 : index
    %4 = vector.load %arg3[%c0_2, %c0_3] : memref<16x32xbf16, #tpu.memory_space<vmem>>, vector<16x32xbf16>
    %c0_4 = arith.constant 0 : index
    %c0_5 = arith.constant 0 : index
    %5 = vector.load %arg4[%c0_4, %c0_5] : memref<32x32xbf16, #tpu.memory_space<vmem>>, vector<32x32xbf16>
    %cst = arith.constant dense<0.000000e+00> : vector<16x32xf32>
    %6 = tpu.matmul %4, %5, %cst {dimension_numbers = #tpu.dot_dimension_numbers<[1], [0], [0], [1], [0, 0, 1, 1], [], []>} : vector<16x32xbf16>, vector<32x32xbf16>, vector<16x32xf32> -> vector<16x32xf32>
    %7 = arith.addf %3, %6 : vector<16x32xf32>
    %c0_6 = arith.constant 0 : index
    %c0_7 = arith.constant 0 : index
    %8 = vector.load %arg7[%c0_6, %c0_7] : memref<16x32xf32, #tpu.memory_space<vmem>>, vector<16x32xf32>
    tpu.vector_store %arg7[%c0_6, %c0_7], %7 {strides = array<i32>} : memref<16x32xf32, #tpu.memory_space<vmem>>, vector<16x32xf32>,
    %c0_i32_8 = arith.constant 0 : i32
    %9 = arith.cmpi eq, %arg2, %c0_i32_8 : i32
    %10 = arith.extui %9 : i1 to i32
    %c0_i32_9 = arith.constant 0 : i32
    %11 = arith.cmpi ne, %10, %c0_i32_9 : i32
    scf.if %11 {
      %c0_10 = arith.constant 0 : index
      %c0_11 = arith.constant 0 : index
      %12 = vector.load %arg7[%c0_10, %c0_11] : memref<16x32xf32, #tpu.memory_space<vmem>>, vector<16x32xf32>
      %c0_12 = arith.constant 0 : index
      %c0_13 = arith.constant 0 : index
      %13 = vector.load %arg5[%c0_12, %c0_13] : memref<16x32xf32, #tpu.memory_space<vmem>>, vector<16x32xf32>
      %14 = arith.addf %12, %13 : vector<16x32xf32>
      %c0_14 = arith.constant 0 : index
      %c0_15 = arith.constant 0 : index
      %15 = vector.load %arg6[%c0_14, %c0_15] : memref<16x32xf32, #tpu.memory_space<vmem>>, vector<16x32xf32>
      tpu.vector_store %arg6[%c0_14, %c0_15], %14 {strides = array<i32>} : memref<16x32xf32, #tpu.memory_space<vmem>>, vector<16x32xf32>,
    } else {
    }
    return
  }
  func.func @transform_0(%arg0: i32, %arg1: i32, %arg2: i32) -> (i32, i32) {
    %c0_i32 = arith.constant 0 : i32
    return %arg0, %arg2 : i32, i32
  }
  func.func @transform_1(%arg0: i32, %arg1: i32, %arg2: i32) -> (i32, i32) {
    %c0_i32 = arith.constant 0 : i32
    return %arg2, %arg1 : i32, i32
  }
  func.func @transform_2(%arg0: i32, %arg1: i32, %arg2: i32) -> (i32, i32) {
    %c0_i32 = arith.constant 0 : i32
    return %arg0, %arg1 : i32, i32
  }
  func.func @transform_3(%arg0: i32, %arg1: i32, %arg2: i32) -> (i32, i32) {
    %c0_i32 = arith.constant 0 : i32
    return %arg0, %arg1 : i32, i32
  }
}

module attributes {stable_mosaic.version = 11 : i64} {
  func.func @_norm_swiglu_kernel(%arg0: i32, %arg1: i32, %arg2: memref<16x32xf32, #tpu.memory_space<vmem>>, %arg3: memref<1x32xf32, #tpu.memory_space<vmem>>, %arg4: memref<32x96xbf16, #tpu.memory_space<vmem>>, %arg5: memref<32x96xbf16, #tpu.memory_space<vmem>>, %arg6: memref<16x96xbf16, #tpu.memory_space<vmem>>, %arg7: memref<16x32xbf16, #tpu.memory_space<vmem>>) attributes {dimension_semantics = [#tpu.dimension_semantics<parallel>, #tpu.dimension_semantics<arbitrary>], iteration_bounds = array<i64: 1, 1>, scalar_prefetch = 0 : i64, scratch_operands = 1 : i64, tpu.core_type = #tpu.core_type<tc>, window_params = [{transform_indices = @transform_0, window_bounds = array<i64: 16, 32>}, {pipeline_mode = #tpu.pipeline_mode<synchronous>, transform_indices = @transform_1, window_bounds = array<i64: 1, 32>}, {transform_indices = @transform_2, window_bounds = array<i64: 32, 96>}, {transform_indices = @transform_3, window_bounds = array<i64: 32, 96>}, {transform_indices = @transform_4, window_bounds = array<i64: 16, 96>}]} {
    %c0_i32 = arith.constant 0 : i32
    %0 = arith.cmpi eq, %arg1, %c0_i32 : i32
    %1 = arith.extui %0 : i1 to i32
    %c0_i32_0 = arith.constant 0 : i32
    %2 = arith.cmpi ne, %1, %c0_i32_0 : i32
    scf.if %2 {
      %c0_10 = arith.constant 0 : index
      %c0_11 = arith.constant 0 : index
      %17 = vector.load %arg2[%c0_10, %c0_11] : memref<16x32xf32, #tpu.memory_space<vmem>>, vector<16x32xf32>
      %18 = arith.mulf %17, %17 : vector<16x32xf32>
      %cst_12 = arith.constant dense<0.000000e+00> : vector<16xf32>
      %19 = vector.multi_reduction <add>, %18, %cst_12 [1] : vector<16x32xf32> to vector<16xf32>
      %20 = vector.shape_cast %19 : vector<16xf32> to vector<16x1xf32>
      %cst_13 = arith.constant 3.200000e+01 : f32
      %21 = vector.broadcast %cst_13 : f32 to vector<16x1xf32>
      %22 = arith.divf %20, %21 : vector<16x1xf32>
      %cst_14 = arith.constant 9.99999974E-6 : f32
      %23 = vector.broadcast %cst_14 : f32 to vector<16x1xf32>
      %24 = arith.addf %22, %23 : vector<16x1xf32>
      %25 = math.rsqrt %24 : vector<16x1xf32>
      %26 = vector.broadcast %25 : vector<16x1xf32> to vector<16x32xf32>
      %27 = arith.mulf %17, %26 : vector<16x32xf32>
      %c0_15 = arith.constant 0 : index
      %c0_16 = arith.constant 0 : index
      %28 = vector.load %arg3[%c0_15, %c0_16] : memref<1x32xf32, #tpu.memory_space<vmem>>, vector<1x32xf32>
      %29 = vector.broadcast %28 : vector<1x32xf32> to vector<16x32xf32>
      %30 = arith.mulf %27, %29 : vector<16x32xf32>
      %31 = arith.truncf %30 : vector<16x32xf32> to vector<16x32xbf16>
      %c0_17 = arith.constant 0 : index
      %c0_18 = arith.constant 0 : index
      %32 = vector.load %arg7[%c0_17, %c0_18] : memref<16x32xbf16, #tpu.memory_space<vmem>>, vector<16x32xbf16>
      tpu.vector_store %arg7[%c0_17, %c0_18], %31 {strides = array<i32>} : memref<16x32xbf16, #tpu.memory_space<vmem>>, vector<16x32xbf16>,
    } else {
    }
    %c0 = arith.constant 0 : index
    %c0_1 = arith.constant 0 : index
    %3 = vector.load %arg7[%c0, %c0_1] : memref<16x32xbf16, #tpu.memory_space<vmem>>, vector<16x32xbf16>
    %c0_2 = arith.constant 0 : index
    %c0_3 = arith.constant 0 : index
    %4 = vector.load %arg4[%c0_2, %c0_3] : memref<32x96xbf16, #tpu.memory_space<vmem>>, vector<32x96xbf16>
    %cst = arith.constant dense<0.000000e+00> : vector<16x96xf32>
    %5 = tpu.matmul %3, %4, %cst {dimension_numbers = #tpu.dot_dimension_numbers<[1], [0], [0], [1], [0, 0, 1, 1], [], []>} : vector<16x32xbf16>, vector<32x96xbf16>, vector<16x96xf32> -> vector<16x96xf32>
    %c0_4 = arith.constant 0 : index
    %c0_5 = arith.constant 0 : index
    %6 = vector.load %arg5[%c0_4, %c0_5] : memref<32x96xbf16, #tpu.memory_space<vmem>>, vector<32x96xbf16>
    %cst_6 = arith.constant dense<0.000000e+00> : vector<16x96xf32>
    %7 = tpu.matmul %3, %6, %cst_6 {dimension_numbers = #tpu.dot_dimension_numbers<[1], [0], [0], [1], [0, 0, 1, 1], [], []>} : vector<16x32xbf16>, vector<32x96xbf16>, vector<16x96xf32> -> vector<16x96xf32>
    %8 = arith.negf %5 : vector<16x96xf32>
    %9 = math.exp %8 : vector<16x96xf32>
    %cst_7 = arith.constant 1.000000e+00 : f32
    %10 = vector.broadcast %cst_7 : f32 to vector<16x96xf32>
    %11 = arith.addf %10, %9 : vector<16x96xf32>
    %12 = arith.divf %10, %11 : vector<16x96xf32>
    %13 = arith.mulf %5, %12 : vector<16x96xf32>
    %14 = arith.mulf %13, %7 : vector<16x96xf32>
    %15 = arith.truncf %14 : vector<16x96xf32> to vector<16x96xbf16>
    %c0_8 = arith.constant 0 : index
    %c0_9 = arith.constant 0 : index
    %16 = vector.load %arg6[%c0_8, %c0_9] : memref<16x96xbf16, #tpu.memory_space<vmem>>, vector<16x96xbf16>
    tpu.vector_store %arg6[%c0_8, %c0_9], %15 {strides = array<i32>} : memref<16x96xbf16, #tpu.memory_space<vmem>>, vector<16x96xbf16>,
    return
  }
  func.func @transform_0(%arg0: i32, %arg1: i32) -> (i32, i32) {
    %c0_i32 = arith.constant 0 : i32
    %c0_i32_0 = arith.constant 0 : i32
    return %arg0, %c0_i32 : i32, i32
  }
  func.func @transform_1(%arg0: i32, %arg1: i32) -> (i32, i32) {
    %c0_i32 = arith.constant 0 : i32
    %c0_i32_0 = arith.constant 0 : i32
    %c0_i32_1 = arith.constant 0 : i32
    return %c0_i32, %c0_i32_0 : i32, i32
  }
  func.func @transform_2(%arg0: i32, %arg1: i32) -> (i32, i32) {
    %c0_i32 = arith.constant 0 : i32
    %c0_i32_0 = arith.constant 0 : i32
    return %c0_i32, %arg1 : i32, i32
  }
  func.func @transform_3(%arg0: i32, %arg1: i32) -> (i32, i32) {
    %c0_i32 = arith.constant 0 : i32
    %c0_i32_0 = arith.constant 0 : i32
    return %c0_i32, %arg1 : i32, i32
  }
  func.func @transform_4(%arg0: i32, %arg1: i32) -> (i32, i32) {
    %c0_i32 = arith.constant 0 : i32
    return %arg0, %arg1 : i32, i32
  }
}

module attributes {stable_mosaic.version = 11 : i64} {
  func.func @_flash_attention_kernel(%arg0: i32, %arg1: i32, %arg2: i32, %arg3: memref<1x8x32xbf16, #tpu.memory_space<vmem>>, %arg4: memref<1x8x16xbf16, #tpu.memory_space<vmem>>, %arg5: memref<1x8x16xbf16, #tpu.memory_space<vmem>>, %arg6: memref<8x8xf32, #tpu.memory_space<vmem>>, %arg7: memref<8x8xf32, #tpu.memory_space<vmem>>, %arg8: memref<8x8xf32, #tpu.memory_space<vmem>>, %arg9: memref<8x8xf32, #tpu.memory_space<vmem>>, %arg10: memref<1x8x32xbf16, #tpu.memory_space<vmem>>, %arg11: memref<8x4xf32, #tpu.memory_space<vmem>>, %arg12: memref<8x4xf32, #tpu.memory_space<vmem>>, %arg13: memref<8x32xf32, #tpu.memory_space<vmem>>) attributes {dimension_semantics = [#tpu.dimension_semantics<parallel>, #tpu.dimension_semantics<parallel>, #tpu.dimension_semantics<arbitrary>], iteration_bounds = array<i64: 2, 1, 1>, scalar_prefetch = 0 : i64, scratch_operands = 3 : i64, tpu.core_type = #tpu.core_type<tc>, window_params = [{transform_indices = @transform_0, window_bounds = array<i64: 1, 8, 32>}, {transform_indices = @transform_1, window_bounds = array<i64: 1, 8, 16>}, {transform_indices = @transform_2, window_bounds = array<i64: 1, 8, 16>}, {transform_indices = @transform_3, window_bounds = array<i64: 8, 8>}, {transform_indices = @transform_4, window_bounds = array<i64: 8, 8>}, {transform_indices = @transform_5, window_bounds = array<i64: 8, 8>}, {transform_indices = @transform_6, window_bounds = array<i64: 8, 8>}, {transform_indices = @transform_7, window_bounds = array<i64: 1, 8, 32>}]} {
    %c0_i32 = arith.constant 0 : i32
    %0 = arith.cmpi eq, %arg2, %c0_i32 : i32
    %1 = arith.extui %0 : i1 to i32
    %c0_i32_0 = arith.constant 0 : i32
    %2 = arith.cmpi ne, %1, %c0_i32_0 : i32
    scf.if %2 {
      %cst_100 = arith.constant -1.000000e+30 : f32
      %195 = vector.broadcast %cst_100 : f32 to vector<8x4xf32>
      %c0_101 = arith.constant 0 : index
      %c0_102 = arith.constant 0 : index
      %196 = vector.load %arg11[%c0_101, %c0_102] : memref<8x4xf32, #tpu.memory_space<vmem>>, vector<8x4xf32>
      tpu.vector_store %arg11[%c0_101, %c0_102], %195 {strides = array<i32>} : memref<8x4xf32, #tpu.memory_space<vmem>>, vector<8x4xf32>,
      %cst_103 = arith.constant 0.000000e+00 : f32
      %197 = vector.broadcast %cst_103 : f32 to vector<8x4xf32>
      %c0_104 = arith.constant 0 : index
      %c0_105 = arith.constant 0 : index
      %198 = vector.load %arg12[%c0_104, %c0_105] : memref<8x4xf32, #tpu.memory_space<vmem>>, vector<8x4xf32>
      tpu.vector_store %arg12[%c0_104, %c0_105], %197 {strides = array<i32>} : memref<8x4xf32, #tpu.memory_space<vmem>>, vector<8x4xf32>,
      %cst_106 = arith.constant 0.000000e+00 : f32
      %199 = vector.broadcast %cst_106 : f32 to vector<8x32xf32>
      %c0_107 = arith.constant 0 : index
      %c0_108 = arith.constant 0 : index
      %200 = vector.load %arg13[%c0_107, %c0_108] : memref<8x32xf32, #tpu.memory_space<vmem>>, vector<8x32xf32>
      tpu.vector_store %arg13[%c0_107, %c0_108], %199 {strides = array<i32>} : memref<8x32xf32, #tpu.memory_space<vmem>>, vector<8x32xf32>,
    } else {
    }
    %3 = tpu.iota {dimensions = array<i32: 0>} : vector<8x8xi32>
    %c8_i32 = arith.constant 8 : i32
    %4 = arith.muli %arg1, %c8_i32 : i32
    %5 = vector.broadcast %4 : i32 to vector<8x8xi32>
    %6 = arith.addi %3, %5 : vector<8x8xi32>
    %7 = tpu.iota {dimensions = array<i32: 1>} : vector<8x8xi32>
    %c8_i32_1 = arith.constant 8 : i32
    %8 = arith.muli %arg2, %c8_i32_1 : i32
    %9 = vector.broadcast %8 : i32 to vector<8x8xi32>
    %10 = arith.addi %7, %9 : vector<8x8xi32>
    %11 = arith.cmpi eq, %10, %6 : vector<8x8xi32>
    %c0 = arith.constant 0 : index
    %c0_2 = arith.constant 0 : index
    %12 = vector.load %arg6[%c0, %c0_2] : memref<8x8xf32, #tpu.memory_space<vmem>>, vector<8x8xf32>
    %c0_3 = arith.constant 0 : index
    %c0_4 = arith.constant 0 : index
    %13 = vector.load %arg7[%c0_3, %c0_4] : memref<8x8xf32, #tpu.memory_space<vmem>>, vector<8x8xf32>
    %c0_5 = arith.constant 0 : index
    %c0_6 = arith.constant 0 : index
    %14 = vector.load %arg8[%c0_5, %c0_6] : memref<8x8xf32, #tpu.memory_space<vmem>>, vector<8x8xf32>
    %c0_7 = arith.constant 0 : index
    %c0_8 = arith.constant 0 : index
    %15 = vector.load %arg9[%c0_7, %c0_8] : memref<8x8xf32, #tpu.memory_space<vmem>>, vector<8x8xf32>
    %c0_9 = arith.constant 0 : index
    %c0_10 = arith.constant 0 : index
    %c0_11 = arith.constant 0 : index
    %16 = vector.load %arg4[%c0_9, %c0_10, %c0_11] : memref<1x8x16xbf16, #tpu.memory_space<vmem>>, vector<1x8x8xbf16>
    %17 = vector.shape_cast %16 : vector<1x8x8xbf16> to vector<8x8xbf16>
    %18 = arith.extf %17 : vector<8x8xbf16> to vector<8x8xf32>
    %19 = vector.extract_strided_slice %18 {offsets = [0, 4], sizes = [8, 4], strides = [1, 1]} : vector<8x8xf32> to vector<8x4xf32>
    %20 = vector.extract_strided_slice %18 {offsets = [0, 0], sizes = [8, 4], strides = [1, 1]} : vector<8x8xf32> to vector<8x4xf32>
    %21 = tpu.concatenate %19, %20 in 1 : vector<8x4xf32>, vector<8x4xf32> -> vector<8x8xf32>
    %22 = arith.mulf %18, %14 : vector<8x8xf32>
    %23 = arith.mulf %21, %15 : vector<8x8xf32>
    %24 = arith.addf %22, %23 : vector<8x8xf32>
    %25 = arith.truncf %24 : vector<8x8xf32> to vector<8x8xbf16>
    %c0_12 = arith.constant 0 : index
    %c0_13 = arith.constant 0 : index
    %c0_14 = arith.constant 0 : index
    %26 = vector.load %arg5[%c0_12, %c0_13, %c0_14] : memref<1x8x16xbf16, #tpu.memory_space<vmem>>, vector<1x8x8xbf16>
    %27 = vector.shape_cast %26 : vector<1x8x8xbf16> to vector<8x8xbf16>
    %c0_15 = arith.constant 0 : index
    %c0_16 = arith.constant 0 : index
    %c0_17 = arith.constant 0 : index
    %28 = vector.load %arg3[%c0_15, %c0_16, %c0_17] : memref<1x8x32xbf16, #tpu.memory_space<vmem>>, vector<1x8x8xbf16>
    %29 = vector.shape_cast %28 : vector<1x8x8xbf16> to vector<8x8xbf16>
    %30 = arith.extf %29 : vector<8x8xbf16> to vector<8x8xf32>
    %31 = vector.extract_strided_slice %30 {offsets = [0, 4], sizes = [8, 4], strides = [1, 1]} : vector<8x8xf32> to vector<8x4xf32>
    %32 = vector.extract_strided_slice %30 {offsets = [0, 0], sizes = [8, 4], strides = [1, 1]} : vector<8x8xf32> to vector<8x4xf32>
    %33 = tpu.concatenate %31, %32 in 1 : vector<8x4xf32>, vector<8x4xf32> -> vector<8x8xf32>
    %34 = arith.mulf %30, %12 : vector<8x8xf32>
    %35 = arith.mulf %33, %13 : vector<8x8xf32>
    %36 = arith.addf %34, %35 : vector<8x8xf32>
    %cst = arith.constant 0.353553385 : f32
    %37 = vector.broadcast %cst : f32 to vector<8x8xf32>
    %38 = arith.mulf %36, %37 : vector<8x8xf32>
    %39 = arith.truncf %38 : vector<8x8xf32> to vector<8x8xbf16>
    %cst_18 = arith.constant dense<0.000000e+00> : vector<8x8xf32>
    %40 = tpu.matmul %39, %25, %cst_18 {dimension_numbers = #tpu.dot_dimension_numbers<[1], [1], [0], [0], [0, 0, 1, 0], [], []>} : vector<8x8xbf16>, vector<8x8xbf16>, vector<8x8xf32> -> vector<8x8xf32>
    %cst_19 = arith.constant 0xFF800000 : f32
    %41 = vector.broadcast %cst_19 : f32 to vector<8x8xf32>
    %42 = arith.select %11, %41, %40 : vector<8x8xi1>, vector<8x8xf32>
    %c0_20 = arith.constant 0 : index
    %c0_21 = arith.constant 0 : index
    %43 = vector.load %arg11[%c0_20, %c0_21] : memref<8x4xf32, #tpu.memory_space<vmem>>, vector<8x1xf32>
    %cst_22 = arith.constant dense<0xFF800000> : vector<8xf32>
    %44 = vector.multi_reduction <maximumf>, %42, %cst_22 [1] : vector<8x8xf32> to vector<8xf32>
    %45 = vector.shape_cast %44 : vector<8xf32> to vector<8x1xf32>
    %46 = arith.maximumf %43, %45 : vector<8x1xf32>
    %47 = arith.subf %43, %46 : vector<8x1xf32>
    %48 = math.exp %47 : vector<8x1xf32>
    %49 = vector.broadcast %46 : vector<8x1xf32> to vector<8x8xf32>
    %50 = arith.subf %42, %49 : vector<8x8xf32>
    %51 = math.exp %50 : vector<8x8xf32>
    %c0_23 = arith.constant 0 : index
    %c0_24 = arith.constant 0 : index
    %52 = vector.load %arg12[%c0_23, %c0_24] : memref<8x4xf32, #tpu.memory_space<vmem>>, vector<8x1xf32>
    %53 = arith.mulf %48, %52 : vector<8x1xf32>
    %cst_25 = arith.constant dense<0.000000e+00> : vector<8xf32>
    %54 = vector.multi_reduction <add>, %51, %cst_25 [1] : vector<8x8xf32> to vector<8xf32>
    %55 = vector.shape_cast %54 : vector<8xf32> to vector<8x1xf32>
    %56 = arith.addf %53, %55 : vector<8x1xf32>
    %c0_26 = arith.constant 0 : index
    %c0_27 = arith.constant 0 : index
    %57 = vector.load %arg12[%c0_26, %c0_27] : memref<8x4xf32, #tpu.memory_space<vmem>>, vector<8x1xf32>
    tpu.vector_store %arg12[%c0_26, %c0_27], %56 {strides = array<i32>} : memref<8x4xf32, #tpu.memory_space<vmem>>, vector<8x1xf32>,
    %c0_28 = arith.constant 0 : index
    %c0_29 = arith.constant 0 : index
    %58 = vector.load %arg13[%c0_28, %c0_29] : memref<8x32xf32, #tpu.memory_space<vmem>>, vector<8x8xf32>
    %59 = vector.broadcast %48 : vector<8x1xf32> to vector<8x8xf32>
    %60 = arith.mulf %59, %58 : vector<8x8xf32>
    %61 = arith.truncf %51 : vector<8x8xf32> to vector<8x8xbf16>
    %cst_30 = arith.constant dense<0.000000e+00> : vector<8x8xf32>
    %62 = tpu.matmul %61, %27, %cst_30 {dimension_numbers = #tpu.dot_dimension_numbers<[1], [0], [0], [1], [0, 0, 1, 1], [], []>} : vector<8x8xbf16>, vector<8x8xbf16>, vector<8x8xf32> -> vector<8x8xf32>
    %63 = arith.addf %60, %62 : vector<8x8xf32>
    %c0_31 = arith.constant 0 : index
    %c0_32 = arith.constant 0 : index
    %64 = vector.load %arg13[%c0_31, %c0_32] : memref<8x32xf32, #tpu.memory_space<vmem>>, vector<8x8xf32>
    tpu.vector_store %arg13[%c0_31, %c0_32], %63 {strides = array<i32>} : memref<8x32xf32, #tpu.memory_space<vmem>>, vector<8x8xf32>,
    %c0_33 = arith.constant 0 : index
    %c0_34 = arith.constant 0 : index
    %65 = vector.load %arg11[%c0_33, %c0_34] : memref<8x4xf32, #tpu.memory_space<vmem>>, vector<8x1xf32>
    tpu.vector_store %arg11[%c0_33, %c0_34], %46 {strides = array<i32>} : memref<8x4xf32, #tpu.memory_space<vmem>>, vector<8x1xf32>,
    %c0_35 = arith.constant 0 : index
    %c0_36 = arith.constant 0 : index
    %c8 = arith.constant 8 : index
    %66 = vector.load %arg3[%c0_35, %c0_36, %c8] : memref<1x8x32xbf16, #tpu.memory_space<vmem>>, vector<1x8x8xbf16>
    %67 = vector.shape_cast %66 : vector<1x8x8xbf16> to vector<8x8xbf16>
    %68 = arith.extf %67 : vector<8x8xbf16> to vector<8x8xf32>
    %69 = vector.extract_strided_slice %68 {offsets = [0, 4], sizes = [8, 4], strides = [1, 1]} : vector<8x8xf32> to vector<8x4xf32>
    %70 = vector.extract_strided_slice %68 {offsets = [0, 0], sizes = [8, 4], strides = [1, 1]} : vector<8x8xf32> to vector<8x4xf32>
    %71 = tpu.concatenate %69, %70 in 1 : vector<8x4xf32>, vector<8x4xf32> -> vector<8x8xf32>
    %72 = arith.mulf %68, %12 : vector<8x8xf32>
    %73 = arith.mulf %71, %13 : vector<8x8xf32>
    %74 = arith.addf %72, %73 : vector<8x8xf32>
    %cst_37 = arith.constant 0.353553385 : f32
    %75 = vector.broadcast %cst_37 : f32 to vector<8x8xf32>
    %76 = arith.mulf %74, %75 : vector<8x8xf32>
    %77 = arith.truncf %76 : vector<8x8xf32> to vector<8x8xbf16>
    %cst_38 = arith.constant dense<0.000000e+00> : vector<8x8xf32>
    %78 = tpu.matmul %77, %25, %cst_38 {dimension_numbers = #tpu.dot_dimension_numbers<[1], [1], [0], [0], [0, 0, 1, 0], [], []>} : vector<8x8xbf16>, vector<8x8xbf16>, vector<8x8xf32> -> vector<8x8xf32>
    %cst_39 = arith.constant 0xFF800000 : f32
    %79 = vector.broadcast %cst_39 : f32 to vector<8x8xf32>
    %80 = arith.select %11, %79, %78 : vector<8x8xi1>, vector<8x8xf32>
    %c0_40 = arith.constant 0 : index
    %c1 = arith.constant 1 : index
    %81 = vector.load %arg11[%c0_40, %c1] : memref<8x4xf32, #tpu.memory_space<vmem>>, vector<8x1xf32>
    %cst_41 = arith.constant dense<0xFF800000> : vector<8xf32>
    %82 = vector.multi_reduction <maximumf>, %80, %cst_41 [1] : vector<8x8xf32> to vector<8xf32>
    %83 = vector.shape_cast %82 : vector<8xf32> to vector<8x1xf32>
    %84 = arith.maximumf %81, %83 : vector<8x1xf32>
    %85 = arith.subf %81, %84 : vector<8x1xf32>
    %86 = math.exp %85 : vector<8x1xf32>
    %87 = vector.broadcast %84 : vector<8x1xf32> to vector<8x8xf32>
    %88 = arith.subf %80, %87 : vector<8x8xf32>
    %89 = math.exp %88 : vector<8x8xf32>
    %c0_42 = arith.constant 0 : index
    %c1_43 = arith.constant 1 : index
    %90 = vector.load %arg12[%c0_42, %c1_43] : memref<8x4xf32, #tpu.memory_space<vmem>>, vector<8x1xf32>
    %91 = arith.mulf %86, %90 : vector<8x1xf32>
    %cst_44 = arith.constant dense<0.000000e+00> : vector<8xf32>
    %92 = vector.multi_reduction <add>, %89, %cst_44 [1] : vector<8x8xf32> to vector<8xf32>
    %93 = vector.shape_cast %92 : vector<8xf32> to vector<8x1xf32>
    %94 = arith.addf %91, %93 : vector<8x1xf32>
    %c0_45 = arith.constant 0 : index
    %c1_46 = arith.constant 1 : index
    %95 = vector.load %arg12[%c0_45, %c1_46] : memref<8x4xf32, #tpu.memory_space<vmem>>, vector<8x1xf32>
    tpu.vector_store %arg12[%c0_45, %c1_46], %94 {strides = array<i32>} : memref<8x4xf32, #tpu.memory_space<vmem>>, vector<8x1xf32>,
    %c0_47 = arith.constant 0 : index
    %c8_48 = arith.constant 8 : index
    %96 = vector.load %arg13[%c0_47, %c8_48] : memref<8x32xf32, #tpu.memory_space<vmem>>, vector<8x8xf32>
    %97 = vector.broadcast %86 : vector<8x1xf32> to vector<8x8xf32>
    %98 = arith.mulf %97, %96 : vector<8x8xf32>
    %99 = arith.truncf %89 : vector<8x8xf32> to vector<8x8xbf16>
    %cst_49 = arith.constant dense<0.000000e+00> : vector<8x8xf32>
    %100 = tpu.matmul %99, %27, %cst_49 {dimension_numbers = #tpu.dot_dimension_numbers<[1], [0], [0], [1], [0, 0, 1, 1], [], []>} : vector<8x8xbf16>, vector<8x8xbf16>, vector<8x8xf32> -> vector<8x8xf32>
    %101 = arith.addf %98, %100 : vector<8x8xf32>
    %c0_50 = arith.constant 0 : index
    %c8_51 = arith.constant 8 : index
    %102 = vector.load %arg13[%c0_50, %c8_51] : memref<8x32xf32, #tpu.memory_space<vmem>>, vector<8x8xf32>
    tpu.vector_store %arg13[%c0_50, %c8_51], %101 {strides = array<i32>} : memref<8x32xf32, #tpu.memory_space<vmem>>, vector<8x8xf32>,
    %c0_52 = arith.constant 0 : index
    %c1_53 = arith.constant 1 : index
    %103 = vector.load %arg11[%c0_52, %c1_53] : memref<8x4xf32, #tpu.memory_space<vmem>>, vector<8x1xf32>
    tpu.vector_store %arg11[%c0_52, %c1_53], %84 {strides = array<i32>} : memref<8x4xf32, #tpu.memory_space<vmem>>, vector<8x1xf32>,
    %c0_54 = arith.constant 0 : index
    %c0_55 = arith.constant 0 : index
    %c8_56 = arith.constant 8 : index
    %104 = vector.load %arg4[%c0_54, %c0_55, %c8_56] : memref<1x8x16xbf16, #tpu.memory_space<vmem>>, vector<1x8x8xbf16>
    %105 = vector.shape_cast %104 : vector<1x8x8xbf16> to vector<8x8xbf16>
    %106 = arith.extf %105 : vector<8x8xbf16> to vector<8x8xf32>
    %107 = vector.extract_strided_slice %106 {offsets = [0, 4], sizes = [8, 4], strides = [1, 1]} : vector<8x8xf32> to vector<8x4xf32>
    %108 = vector.extract_strided_slice %106 {offsets = [0, 0], sizes = [8, 4], strides = [1, 1]} : vector<8x8xf32> to vector<8x4xf32>
    %109 = tpu.concatenate %107, %108 in 1 : vector<8x4xf32>, vector<8x4xf32> -> vector<8x8xf32>
    %110 = arith.mulf %106, %14 : vector<8x8xf32>
    %111 = arith.mulf %109, %15 : vector<8x8xf32>
    %112 = arith.addf %110, %111 : vector<8x8xf32>
    %113 = arith.truncf %112 : vector<8x8xf32> to vector<8x8xbf16>
    %c0_57 = arith.constant 0 : index
    %c0_58 = arith.constant 0 : index
    %c8_59 = arith.constant 8 : index
    %114 = vector.load %arg5[%c0_57, %c0_58, %c8_59] : memref<1x8x16xbf16, #tpu.memory_space<vmem>>, vector<1x8x8xbf16>
    %115 = vector.shape_cast %114 : vector<1x8x8xbf16> to vector<8x8xbf16>
    %c0_60 = arith.constant 0 : index
    %c0_61 = arith.constant 0 : index
    %c16 = arith.constant 16 : index
    %116 = vector.load %arg3[%c0_60, %c0_61, %c16] : memref<1x8x32xbf16, #tpu.memory_space<vmem>>, vector<1x8x8xbf16>
    %117 = vector.shape_cast %116 : vector<1x8x8xbf16> to vector<8x8xbf16>
    %118 = arith.extf %117 : vector<8x8xbf16> to vector<8x8xf32>
    %119 = vector.extract_strided_slice %118 {offsets = [0, 4], sizes = [8, 4], strides = [1, 1]} : vector<8x8xf32> to vector<8x4xf32>
    %120 = vector.extract_strided_slice %118 {offsets = [0, 0], sizes = [8, 4], strides = [1, 1]} : vector<8x8xf32> to vector<8x4xf32>
    %121 = tpu.concatenate %119, %120 in 1 : vector<8x4xf32>, vector<8x4xf32> -> vector<8x8xf32>
    %122 = arith.mulf %118, %12 : vector<8x8xf32>
    %123 = arith.mulf %121, %13 : vector<8x8xf32>
    %124 = arith.addf %122, %123 : vector<8x8xf32>
    %cst_62 = arith.constant 0.353553385 : f32
    %125 = vector.broadcast %cst_62 : f32 to vector<8x8xf32>
    %126 = arith.mulf %124, %125 : vector<8x8xf32>
    %127 = arith.truncf %126 : vector<8x8xf32> to vector<8x8xbf16>
    %cst_63 = arith.constant dense<0.000000e+00> : vector<8x8xf32>
    %128 = tpu.matmul %127, %113, %cst_63 {dimension_numbers = #tpu.dot_dimension_numbers<[1], [1], [0], [0], [0, 0, 1, 0], [], []>} : vector<8x8xbf16>, vector<8x8xbf16>, vector<8x8xf32> -> vector<8x8xf32>
    %cst_64 = arith.constant 0xFF800000 : f32
    %129 = vector.broadcast %cst_64 : f32 to vector<8x8xf32>
    %130 = arith.select %11, %129, %128 : vector<8x8xi1>, vector<8x8xf32>
    %c0_65 = arith.constant 0 : index
    %c2 = arith.constant 2 : index
    %131 = vector.load %arg11[%c0_65, %c2] : memref<8x4xf32, #tpu.memory_space<vmem>>, vector<8x1xf32>
    %cst_66 = arith.constant dense<0xFF800000> : vector<8xf32>
    %132 = vector.multi_reduction <maximumf>, %130, %cst_66 [1] : vector<8x8xf32> to vector<8xf32>
    %133 = vector.shape_cast %132 : vector<8xf32> to vector<8x1xf32>
    %134 = arith.maximumf %131, %133 : vector<8x1xf32>
    %135 = arith.subf %131, %134 : vector<8x1xf32>
    %136 = math.exp %135 : vector<8x1xf32>
    %137 = vector.broadcast %134 : vector<8x1xf32> to vector<8x8xf32>
    %138 = arith.subf %130, %137 : vector<8x8xf32>
    %139 = math.exp %138 : vector<8x8xf32>
    %c0_67 = arith.constant 0 : index
    %c2_68 = arith.constant 2 : index
    %140 = vector.load %arg12[%c0_67, %c2_68] : memref<8x4xf32, #tpu.memory_space<vmem>>, vector<8x1xf32>
    %141 = arith.mulf %136, %140 : vector<8x1xf32>
    %cst_69 = arith.constant dense<0.000000e+00> : vector<8xf32>
    %142 = vector.multi_reduction <add>, %139, %cst_69 [1] : vector<8x8xf32> to vector<8xf32>
    %143 = vector.shape_cast %142 : vector<8xf32> to vector<8x1xf32>
    %144 = arith.addf %141, %143 : vector<8x1xf32>
    %c0_70 = arith.constant 0 : index
    %c2_71 = arith.constant 2 : index
    %145 = vector.load %arg12[%c0_70, %c2_71] : memref<8x4xf32, #tpu.memory_space<vmem>>, vector<8x1xf32>
    tpu.vector_store %arg12[%c0_70, %c2_71], %144 {strides = array<i32>} : memref<8x4xf32, #tpu.memory_space<vmem>>, vector<8x1xf32>,
    %c0_72 = arith.constant 0 : index
    %c16_73 = arith.constant 16 : index
    %146 = vector.load %arg13[%c0_72, %c16_73] : memref<8x32xf32, #tpu.memory_space<vmem>>, vector<8x8xf32>
    %147 = vector.broadcast %136 : vector<8x1xf32> to vector<8x8xf32>
    %148 = arith.mulf %147, %146 : vector<8x8xf32>
    %149 = arith.truncf %139 : vector<8x8xf32> to vector<8x8xbf16>
    %cst_74 = arith.constant dense<0.000000e+00> : vector<8x8xf32>
    %150 = tpu.matmul %149, %115, %cst_74 {dimension_numbers = #tpu.dot_dimension_numbers<[1], [0], [0], [1], [0, 0, 1, 1], [], []>} : vector<8x8xbf16>, vector<8x8xbf16>, vector<8x8xf32> -> vector<8x8xf32>
    %151 = arith.addf %148, %150 : vector<8x8xf32>
    %c0_75 = arith.constant 0 : index
    %c16_76 = arith.constant 16 : index
    %152 = vector.load %arg13[%c0_75, %c16_76] : memref<8x32xf32, #tpu.memory_space<vmem>>, vector<8x8xf32>
    tpu.vector_store %arg13[%c0_75, %c16_76], %151 {strides = array<i32>} : memref<8x32xf32, #tpu.memory_space<vmem>>, vector<8x8xf32>,
    %c0_77 = arith.constant 0 : index
    %c2_78 = arith.constant 2 : index
    %153 = vector.load %arg11[%c0_77, %c2_78] : memref<8x4xf32, #tpu.memory_space<vmem>>, vector<8x1xf32>
    tpu.vector_store %arg11[%c0_77, %c2_78], %134 {strides = array<i32>} : memref<8x4xf32, #tpu.memory_space<vmem>>, vector<8x1xf32>,
    %c0_79 = arith.constant 0 : index
    %c0_80 = arith.constant 0 : index
    %c24 = arith.constant 24 : index
    %154 = vector.load %arg3[%c0_79, %c0_80, %c24] : memref<1x8x32xbf16, #tpu.memory_space<vmem>>, vector<1x8x8xbf16>
    %155 = vector.shape_cast %154 : vector<1x8x8xbf16> to vector<8x8xbf16>
    %156 = arith.extf %155 : vector<8x8xbf16> to vector<8x8xf32>
    %157 = vector.extract_strided_slice %156 {offsets = [0, 4], sizes = [8, 4], strides = [1, 1]} : vector<8x8xf32> to vector<8x4xf32>
    %158 = vector.extract_strided_slice %156 {offsets = [0, 0], sizes = [8, 4], strides = [1, 1]} : vector<8x8xf32> to vector<8x4xf32>
    %159 = tpu.concatenate %157, %158 in 1 : vector<8x4xf32>, vector<8x4xf32> -> vector<8x8xf32>
    %160 = arith.mulf %156, %12 : vector<8x8xf32>
    %161 = arith.mulf %159, %13 : vector<8x8xf32>
    %162 = arith.addf %160, %161 : vector<8x8xf32>
    %cst_81 = arith.constant 0.353553385 : f32
    %163 = vector.broadcast %cst_81 : f32 to vector<8x8xf32>
    %164 = arith.mulf %162, %163 : vector<8x8xf32>
    %165 = arith.truncf %164 : vector<8x8xf32> to vector<8x8xbf16>
    %cst_82 = arith.constant dense<0.000000e+00> : vector<8x8xf32>
    %166 = tpu.matmul %165, %113, %cst_82 {dimension_numbers = #tpu.dot_dimension_numbers<[1], [1], [0], [0], [0, 0, 1, 0], [], []>} : vector<8x8xbf16>, vector<8x8xbf16>, vector<8x8xf32> -> vector<8x8xf32>
    %cst_83 = arith.constant 0xFF800000 : f32
    %167 = vector.broadcast %cst_83 : f32 to vector<8x8xf32>
    %168 = arith.select %11, %167, %166 : vector<8x8xi1>, vector<8x8xf32>
    %c0_84 = arith.constant 0 : index
    %c3 = arith.constant 3 : index
    %169 = vector.load %arg11[%c0_84, %c3] : memref<8x4xf32, #tpu.memory_space<vmem>>, vector<8x1xf32>
    %cst_85 = arith.constant dense<0xFF800000> : vector<8xf32>
    %170 = vector.multi_reduction <maximumf>, %168, %cst_85 [1] : vector<8x8xf32> to vector<8xf32>
    %171 = vector.shape_cast %170 : vector<8xf32> to vector<8x1xf32>
    %172 = arith.maximumf %169, %171 : vector<8x1xf32>
    %173 = arith.subf %169, %172 : vector<8x1xf32>
    %174 = math.exp %173 : vector<8x1xf32>
    %175 = vector.broadcast %172 : vector<8x1xf32> to vector<8x8xf32>
    %176 = arith.subf %168, %175 : vector<8x8xf32>
    %177 = math.exp %176 : vector<8x8xf32>
    %c0_86 = arith.constant 0 : index
    %c3_87 = arith.constant 3 : index
    %178 = vector.load %arg12[%c0_86, %c3_87] : memref<8x4xf32, #tpu.memory_space<vmem>>, vector<8x1xf32>
    %179 = arith.mulf %174, %178 : vector<8x1xf32>
    %cst_88 = arith.constant dense<0.000000e+00> : vector<8xf32>
    %180 = vector.multi_reduction <add>, %177, %cst_88 [1] : vector<8x8xf32> to vector<8xf32>
    %181 = vector.shape_cast %180 : vector<8xf32> to vector<8x1xf32>
    %182 = arith.addf %179, %181 : vector<8x1xf32>
    %c0_89 = arith.constant 0 : index
    %c3_90 = arith.constant 3 : index
    %183 = vector.load %arg12[%c0_89, %c3_90] : memref<8x4xf32, #tpu.memory_space<vmem>>, vector<8x1xf32>
    tpu.vector_store %arg12[%c0_89, %c3_90], %182 {strides = array<i32>} : memref<8x4xf32, #tpu.memory_space<vmem>>, vector<8x1xf32>,
    %c0_91 = arith.constant 0 : index
    %c24_92 = arith.constant 24 : index
    %184 = vector.load %arg13[%c0_91, %c24_92] : memref<8x32xf32, #tpu.memory_space<vmem>>, vector<8x8xf32>
    %185 = vector.broadcast %174 : vector<8x1xf32> to vector<8x8xf32>
    %186 = arith.mulf %185, %184 : vector<8x8xf32>
    %187 = arith.truncf %177 : vector<8x8xf32> to vector<8x8xbf16>
    %cst_93 = arith.constant dense<0.000000e+00> : vector<8x8xf32>
    %188 = tpu.matmul %187, %115, %cst_93 {dimension_numbers = #tpu.dot_dimension_numbers<[1], [0], [0], [1], [0, 0, 1, 1], [], []>} : vector<8x8xbf16>, vector<8x8xbf16>, vector<8x8xf32> -> vector<8x8xf32>
    %189 = arith.addf %186, %188 : vector<8x8xf32>
    %c0_94 = arith.constant 0 : index
    %c24_95 = arith.constant 24 : index
    %190 = vector.load %arg13[%c0_94, %c24_95] : memref<8x32xf32, #tpu.memory_space<vmem>>, vector<8x8xf32>
    tpu.vector_store %arg13[%c0_94, %c24_95], %189 {strides = array<i32>} : memref<8x32xf32, #tpu.memory_space<vmem>>, vector<8x8xf32>,
    %c0_96 = arith.constant 0 : index
    %c3_97 = arith.constant 3 : index
    %191 = vector.load %arg11[%c0_96, %c3_97] : memref<8x4xf32, #tpu.memory_space<vmem>>, vector<8x1xf32>
    tpu.vector_store %arg11[%c0_96, %c3_97], %172 {strides = array<i32>} : memref<8x4xf32, #tpu.memory_space<vmem>>, vector<8x1xf32>,
    %c0_i32_98 = arith.constant 0 : i32
    %192 = arith.cmpi eq, %arg2, %c0_i32_98 : i32
    %193 = arith.extui %192 : i1 to i32
    %c0_i32_99 = arith.constant 0 : i32
    %194 = arith.cmpi ne, %193, %c0_i32_99 : i32
    scf.if %194 {
      %c0_100 = arith.constant 0 : index
      %c0_101 = arith.constant 0 : index
      %195 = vector.load %arg12[%c0_100, %c0_101] : memref<8x4xf32, #tpu.memory_space<vmem>>, vector<8x1xf32>
      %cst_102 = arith.constant 1.000000e+00 : f32
      %196 = vector.broadcast %cst_102 : f32 to vector<8x1xf32>
      %197 = arith.divf %196, %195 : vector<8x1xf32>
      %c0_103 = arith.constant 0 : index
      %c0_104 = arith.constant 0 : index
      %198 = vector.load %arg13[%c0_103, %c0_104] : memref<8x32xf32, #tpu.memory_space<vmem>>, vector<8x8xf32>
      %199 = vector.broadcast %197 : vector<8x1xf32> to vector<8x8xf32>
      %200 = arith.mulf %198, %199 : vector<8x8xf32>
      %201 = arith.truncf %200 : vector<8x8xf32> to vector<8x8xbf16>
      %c0_105 = arith.constant 0 : index
      %c0_106 = arith.constant 0 : index
      %c0_107 = arith.constant 0 : index
      %202 = vector.load %arg10[%c0_105, %c0_106, %c0_107] : memref<1x8x32xbf16, #tpu.memory_space<vmem>>, vector<1x8x8xbf16>
      %203 = vector.shape_cast %202 : vector<1x8x8xbf16> to vector<8x8xbf16>
      %204 = vector.shape_cast %201 : vector<8x8xbf16> to vector<1x8x8xbf16>
      tpu.vector_store %arg10[%c0_105, %c0_106, %c0_107], %204 {strides = array<i32>} : memref<1x8x32xbf16, #tpu.memory_space<vmem>>, vector<1x8x8xbf16>,
      %c0_108 = arith.constant 0 : index
      %c1_109 = arith.constant 1 : index
      %205 = vector.load %arg12[%c0_108, %c1_109] : memref<8x4xf32, #tpu.memory_space<vmem>>, vector<8x1xf32>
      %cst_110 = arith.constant 1.000000e+00 : f32
      %206 = vector.broadcast %cst_110 : f32 to vector<8x1xf32>
      %207 = arith.divf %206, %205 : vector<8x1xf32>
      %c0_111 = arith.constant 0 : index
      %c8_112 = arith.constant 8 : index
      %208 = vector.load %arg13[%c0_111, %c8_112] : memref<8x32xf32, #tpu.memory_space<vmem>>, vector<8x8xf32>
      %209 = vector.broadcast %207 : vector<8x1xf32> to vector<8x8xf32>
      %210 = arith.mulf %208, %209 : vector<8x8xf32>
      %211 = arith.truncf %210 : vector<8x8xf32> to vector<8x8xbf16>
      %c0_113 = arith.constant 0 : index
      %c0_114 = arith.constant 0 : index
      %c8_115 = arith.constant 8 : index
      %212 = vector.load %arg10[%c0_113, %c0_114, %c8_115] : memref<1x8x32xbf16, #tpu.memory_space<vmem>>, vector<1x8x8xbf16>
      %213 = vector.shape_cast %212 : vector<1x8x8xbf16> to vector<8x8xbf16>
      %214 = vector.shape_cast %211 : vector<8x8xbf16> to vector<1x8x8xbf16>
      tpu.vector_store %arg10[%c0_113, %c0_114, %c8_115], %214 {strides = array<i32>} : memref<1x8x32xbf16, #tpu.memory_space<vmem>>, vector<1x8x8xbf16>,
      %c0_116 = arith.constant 0 : index
      %c2_117 = arith.constant 2 : index
      %215 = vector.load %arg12[%c0_116, %c2_117] : memref<8x4xf32, #tpu.memory_space<vmem>>, vector<8x1xf32>
      %cst_118 = arith.constant 1.000000e+00 : f32
      %216 = vector.broadcast %cst_118 : f32 to vector<8x1xf32>
      %217 = arith.divf %216, %215 : vector<8x1xf32>
      %c0_119 = arith.constant 0 : index
      %c16_120 = arith.constant 16 : index
      %218 = vector.load %arg13[%c0_119, %c16_120] : memref<8x32xf32, #tpu.memory_space<vmem>>, vector<8x8xf32>
      %219 = vector.broadcast %217 : vector<8x1xf32> to vector<8x8xf32>
      %220 = arith.mulf %218, %219 : vector<8x8xf32>
      %221 = arith.truncf %220 : vector<8x8xf32> to vector<8x8xbf16>
      %c0_121 = arith.constant 0 : index
      %c0_122 = arith.constant 0 : index
      %c16_123 = arith.constant 16 : index
      %222 = vector.load %arg10[%c0_121, %c0_122, %c16_123] : memref<1x8x32xbf16, #tpu.memory_space<vmem>>, vector<1x8x8xbf16>
      %223 = vector.shape_cast %222 : vector<1x8x8xbf16> to vector<8x8xbf16>
      %224 = vector.shape_cast %221 : vector<8x8xbf16> to vector<1x8x8xbf16>
      tpu.vector_store %arg10[%c0_121, %c0_122, %c16_123], %224 {strides = array<i32>} : memref<1x8x32xbf16, #tpu.memory_space<vmem>>, vector<1x8x8xbf16>,
      %c0_124 = arith.constant 0 : index
      %c3_125 = arith.constant 3 : index
      %225 = vector.load %arg12[%c0_124, %c3_125] : memref<8x4xf32, #tpu.memory_space<vmem>>, vector<8x1xf32>
      %cst_126 = arith.constant 1.000000e+00 : f32
      %226 = vector.broadcast %cst_126 : f32 to vector<8x1xf32>
      %227 = arith.divf %226, %225 : vector<8x1xf32>
      %c0_127 = arith.constant 0 : index
      %c24_128 = arith.constant 24 : index
      %228 = vector.load %arg13[%c0_127, %c24_128] : memref<8x32xf32, #tpu.memory_space<vmem>>, vector<8x8xf32>
      %229 = vector.broadcast %227 : vector<8x1xf32> to vector<8x8xf32>
      %230 = arith.mulf %228, %229 : vector<8x8xf32>
      %231 = arith.truncf %230 : vector<8x8xf32> to vector<8x8xbf16>
      %c0_129 = arith.constant 0 : index
      %c0_130 = arith.constant 0 : index
      %c24_131 = arith.constant 24 : index
      %232 = vector.load %arg10[%c0_129, %c0_130, %c24_131] : memref<1x8x32xbf16, #tpu.memory_space<vmem>>, vector<1x8x8xbf16>
      %233 = vector.shape_cast %232 : vector<1x8x8xbf16> to vector<8x8xbf16>
      %234 = vector.shape_cast %231 : vector<8x8xbf16> to vector<1x8x8xbf16>
      tpu.vector_store %arg10[%c0_129, %c0_130, %c24_131], %234 {strides = array<i32>} : memref<1x8x32xbf16, #tpu.memory_space<vmem>>, vector<1x8x8xbf16>,
    } else {
    }
    return
  }
  func.func @transform_0(%arg0: i32, %arg1: i32, %arg2: i32) -> (i32, i32, i32) {
    %c0_i32 = arith.constant 0 : i32
    %c0_i32_0 = arith.constant 0 : i32
    return %arg0, %arg1, %c0_i32 : i32, i32, i32
  }
  func.func @transform_1(%arg0: i32, %arg1: i32, %arg2: i32) -> (i32, i32, i32) {
    %c0_i32 = arith.constant 0 : i32
    %c0_i32_0 = arith.constant 0 : i32
    return %arg0, %arg2, %c0_i32 : i32, i32, i32
  }
  func.func @transform_2(%arg0: i32, %arg1: i32, %arg2: i32) -> (i32, i32, i32) {
    %c0_i32 = arith.constant 0 : i32
    %c0_i32_0 = arith.constant 0 : i32
    return %arg0, %arg2, %c0_i32 : i32, i32, i32
  }
  func.func @transform_3(%arg0: i32, %arg1: i32, %arg2: i32) -> (i32, i32) {
    %c0_i32 = arith.constant 0 : i32
    %c0_i32_0 = arith.constant 0 : i32
    return %arg1, %c0_i32 : i32, i32
  }
  func.func @transform_4(%arg0: i32, %arg1: i32, %arg2: i32) -> (i32, i32) {
    %c0_i32 = arith.constant 0 : i32
    %c0_i32_0 = arith.constant 0 : i32
    return %arg1, %c0_i32 : i32, i32
  }
  func.func @transform_5(%arg0: i32, %arg1: i32, %arg2: i32) -> (i32, i32) {
    %c0_i32 = arith.constant 0 : i32
    %c0_i32_0 = arith.constant 0 : i32
    return %arg2, %c0_i32 : i32, i32
  }
  func.func @transform_6(%arg0: i32, %arg1: i32, %arg2: i32) -> (i32, i32) {
    %c0_i32 = arith.constant 0 : i32
    %c0_i32_0 = arith.constant 0 : i32
    return %arg2, %c0_i32 : i32, i32
  }
  func.func @transform_7(%arg0: i32, %arg1: i32, %arg2: i32) -> (i32, i32, i32) {
    %c0_i32 = arith.constant 0 : i32
    %c0_i32_0 = arith.constant 0 : i32
    return %arg0, %arg1, %c0_i32 : i32, i32, i32
  }
}

module attributes {stable_mosaic.version = 11 : i64} {
  func.func @_matmul_residual_kernel(%arg0: i32, %arg1: i32, %arg2: i32, %arg3: memref<16x96xbf16, #tpu.memory_space<vmem>>, %arg4: memref<96x32xbf16, #tpu.memory_space<vmem>>, %arg5: memref<16x32xf32, #tpu.memory_space<vmem>>, %arg6: memref<16x32xf32, #tpu.memory_space<vmem>>, %arg7: memref<16x32xf32, #tpu.memory_space<vmem>>) attributes {dimension_semantics = [#tpu.dimension_semantics<parallel>, #tpu.dimension_semantics<parallel>, #tpu.dimension_semantics<arbitrary>], iteration_bounds = array<i64: 1, 1, 1>, scalar_prefetch = 0 : i64, scratch_operands = 1 : i64, tpu.core_type = #tpu.core_type<tc>, window_params = [{transform_indices = @transform_0, window_bounds = array<i64: 16, 96>}, {transform_indices = @transform_1, window_bounds = array<i64: 96, 32>}, {transform_indices = @transform_2, window_bounds = array<i64: 16, 32>}, {transform_indices = @transform_3, window_bounds = array<i64: 16, 32>}]} {
    %c0_i32 = arith.constant 0 : i32
    %0 = arith.cmpi eq, %arg2, %c0_i32 : i32
    %1 = arith.extui %0 : i1 to i32
    %c0_i32_0 = arith.constant 0 : i32
    %2 = arith.cmpi ne, %1, %c0_i32_0 : i32
    scf.if %2 {
      %cst_10 = arith.constant 0.000000e+00 : f32
      %12 = vector.broadcast %cst_10 : f32 to vector<16x32xf32>
      %c0_11 = arith.constant 0 : index
      %c0_12 = arith.constant 0 : index
      %13 = vector.load %arg7[%c0_11, %c0_12] : memref<16x32xf32, #tpu.memory_space<vmem>>, vector<16x32xf32>
      tpu.vector_store %arg7[%c0_11, %c0_12], %12 {strides = array<i32>} : memref<16x32xf32, #tpu.memory_space<vmem>>, vector<16x32xf32>,
    } else {
    }
    %c0 = arith.constant 0 : index
    %c0_1 = arith.constant 0 : index
    %3 = vector.load %arg7[%c0, %c0_1] : memref<16x32xf32, #tpu.memory_space<vmem>>, vector<16x32xf32>
    %c0_2 = arith.constant 0 : index
    %c0_3 = arith.constant 0 : index
    %4 = vector.load %arg3[%c0_2, %c0_3] : memref<16x96xbf16, #tpu.memory_space<vmem>>, vector<16x96xbf16>
    %c0_4 = arith.constant 0 : index
    %c0_5 = arith.constant 0 : index
    %5 = vector.load %arg4[%c0_4, %c0_5] : memref<96x32xbf16, #tpu.memory_space<vmem>>, vector<96x32xbf16>
    %cst = arith.constant dense<0.000000e+00> : vector<16x32xf32>
    %6 = tpu.matmul %4, %5, %cst {dimension_numbers = #tpu.dot_dimension_numbers<[1], [0], [0], [1], [0, 0, 1, 1], [], []>} : vector<16x96xbf16>, vector<96x32xbf16>, vector<16x32xf32> -> vector<16x32xf32>
    %7 = arith.addf %3, %6 : vector<16x32xf32>
    %c0_6 = arith.constant 0 : index
    %c0_7 = arith.constant 0 : index
    %8 = vector.load %arg7[%c0_6, %c0_7] : memref<16x32xf32, #tpu.memory_space<vmem>>, vector<16x32xf32>
    tpu.vector_store %arg7[%c0_6, %c0_7], %7 {strides = array<i32>} : memref<16x32xf32, #tpu.memory_space<vmem>>, vector<16x32xf32>,
    %c0_i32_8 = arith.constant 0 : i32
    %9 = arith.cmpi eq, %arg2, %c0_i32_8 : i32
    %10 = arith.extui %9 : i1 to i32
    %c0_i32_9 = arith.constant 0 : i32
    %11 = arith.cmpi ne, %10, %c0_i32_9 : i32
    scf.if %11 {
      %c0_10 = arith.constant 0 : index
      %c0_11 = arith.constant 0 : index
      %12 = vector.load %arg7[%c0_10, %c0_11] : memref<16x32xf32, #tpu.memory_space<vmem>>, vector<16x32xf32>
      %c0_12 = arith.constant 0 : index
      %c0_13 = arith.constant 0 : index
      %13 = vector.load %arg5[%c0_12, %c0_13] : memref<16x32xf32, #tpu.memory_space<vmem>>, vector<16x32xf32>
      %14 = arith.addf %12, %13 : vector<16x32xf32>
      %c0_14 = arith.constant 0 : index
      %c0_15 = arith.constant 0 : index
      %15 = vector.load %arg6[%c0_14, %c0_15] : memref<16x32xf32, #tpu.memory_space<vmem>>, vector<16x32xf32>
      tpu.vector_store %arg6[%c0_14, %c0_15], %14 {strides = array<i32>} : memref<16x32xf32, #tpu.memory_space<vmem>>, vector<16x32xf32>,
    } else {
    }
    return
  }
  func.func @transform_0(%arg0: i32, %arg1: i32, %arg2: i32) -> (i32, i32) {
    %c0_i32 = arith.constant 0 : i32
    return %arg0, %arg2 : i32, i32
  }
  func.func @transform_1(%arg0: i32, %arg1: i32, %arg2: i32) -> (i32, i32) {
    %c0_i32 = arith.constant 0 : i32
    return %arg2, %arg1 : i32, i32
  }
  func.func @transform_2(%arg0: i32, %arg1: i32, %arg2: i32) -> (i32, i32) {
    %c0_i32 = arith.constant 0 : i32
    return %arg0, %arg1 : i32, i32
  }
  func.func @transform_3(%arg0: i32, %arg1: i32, %arg2: i32) -> (i32, i32) {
    %c0_i32 = arith.constant 0 : i32
    return %arg0, %arg1 : i32, i32
  }
}

module attributes {stable_mosaic.version = 11 : i64} {
  func.func @_norm_matmul_kernel(%arg0: i32, %arg1: i32, %arg2: memref<16x32xf32, #tpu.memory_space<vmem>>, %arg3: memref<1x32xf32, #tpu.memory_space<vmem>>, %arg4: memref<32x64xbf16, #tpu.memory_space<vmem>>, %arg5: memref<16x64xbf16, #tpu.memory_space<vmem>>, %arg6: memref<16x32xbf16, #tpu.memory_space<vmem>>) attributes {dimension_semantics = [#tpu.dimension_semantics<parallel>, #tpu.dimension_semantics<arbitrary>], iteration_bounds = array<i64: 1, 1>, scalar_prefetch = 0 : i64, scratch_operands = 1 : i64, tpu.core_type = #tpu.core_type<tc>, window_params = [{transform_indices = @transform_0, window_bounds = array<i64: 16, 32>}, {pipeline_mode = #tpu.pipeline_mode<synchronous>, transform_indices = @transform_1, window_bounds = array<i64: 1, 32>}, {transform_indices = @transform_2, window_bounds = array<i64: 32, 64>}, {transform_indices = @transform_3, window_bounds = array<i64: 16, 64>}]} {
    %c0_i32 = arith.constant 0 : i32
    %0 = arith.cmpi eq, %arg1, %c0_i32 : i32
    %1 = arith.extui %0 : i1 to i32
    %c0_i32_0 = arith.constant 0 : i32
    %2 = arith.cmpi ne, %1, %c0_i32_0 : i32
    scf.if %2 {
      %c0_6 = arith.constant 0 : index
      %c0_7 = arith.constant 0 : index
      %8 = vector.load %arg2[%c0_6, %c0_7] : memref<16x32xf32, #tpu.memory_space<vmem>>, vector<16x32xf32>
      %9 = arith.mulf %8, %8 : vector<16x32xf32>
      %cst_8 = arith.constant dense<0.000000e+00> : vector<16xf32>
      %10 = vector.multi_reduction <add>, %9, %cst_8 [1] : vector<16x32xf32> to vector<16xf32>
      %11 = vector.shape_cast %10 : vector<16xf32> to vector<16x1xf32>
      %cst_9 = arith.constant 3.200000e+01 : f32
      %12 = vector.broadcast %cst_9 : f32 to vector<16x1xf32>
      %13 = arith.divf %11, %12 : vector<16x1xf32>
      %cst_10 = arith.constant 9.99999974E-6 : f32
      %14 = vector.broadcast %cst_10 : f32 to vector<16x1xf32>
      %15 = arith.addf %13, %14 : vector<16x1xf32>
      %16 = math.rsqrt %15 : vector<16x1xf32>
      %17 = vector.broadcast %16 : vector<16x1xf32> to vector<16x32xf32>
      %18 = arith.mulf %8, %17 : vector<16x32xf32>
      %c0_11 = arith.constant 0 : index
      %c0_12 = arith.constant 0 : index
      %19 = vector.load %arg3[%c0_11, %c0_12] : memref<1x32xf32, #tpu.memory_space<vmem>>, vector<1x32xf32>
      %20 = vector.broadcast %19 : vector<1x32xf32> to vector<16x32xf32>
      %21 = arith.mulf %18, %20 : vector<16x32xf32>
      %22 = arith.truncf %21 : vector<16x32xf32> to vector<16x32xbf16>
      %c0_13 = arith.constant 0 : index
      %c0_14 = arith.constant 0 : index
      %23 = vector.load %arg6[%c0_13, %c0_14] : memref<16x32xbf16, #tpu.memory_space<vmem>>, vector<16x32xbf16>
      tpu.vector_store %arg6[%c0_13, %c0_14], %22 {strides = array<i32>} : memref<16x32xbf16, #tpu.memory_space<vmem>>, vector<16x32xbf16>,
    } else {
    }
    %c0 = arith.constant 0 : index
    %c0_1 = arith.constant 0 : index
    %3 = vector.load %arg6[%c0, %c0_1] : memref<16x32xbf16, #tpu.memory_space<vmem>>, vector<16x32xbf16>
    %c0_2 = arith.constant 0 : index
    %c0_3 = arith.constant 0 : index
    %4 = vector.load %arg4[%c0_2, %c0_3] : memref<32x64xbf16, #tpu.memory_space<vmem>>, vector<32x64xbf16>
    %cst = arith.constant dense<0.000000e+00> : vector<16x64xf32>
    %5 = tpu.matmul %3, %4, %cst {dimension_numbers = #tpu.dot_dimension_numbers<[1], [0], [0], [1], [0, 0, 1, 1], [], []>} : vector<16x32xbf16>, vector<32x64xbf16>, vector<16x64xf32> -> vector<16x64xf32>
    %6 = arith.truncf %5 : vector<16x64xf32> to vector<16x64xbf16>
    %c0_4 = arith.constant 0 : index
    %c0_5 = arith.constant 0 : index
    %7 = vector.load %arg5[%c0_4, %c0_5] : memref<16x64xbf16, #tpu.memory_space<vmem>>, vector<16x64xbf16>
    tpu.vector_store %arg5[%c0_4, %c0_5], %6 {strides = array<i32>} : memref<16x64xbf16, #tpu.memory_space<vmem>>, vector<16x64xbf16>,
    return
  }
  func.func @transform_0(%arg0: i32, %arg1: i32) -> (i32, i32) {
    %c0_i32 = arith.constant 0 : i32
    %c0_i32_0 = arith.constant 0 : i32
    return %arg0, %c0_i32 : i32, i32
  }
  func.func @transform_1(%arg0: i32, %arg1: i32) -> (i32, i32) {
    %c0_i32 = arith.constant 0 : i32
    %c0_i32_0 = arith.constant 0 : i32
    %c0_i32_1 = arith.constant 0 : i32
    return %c0_i32, %c0_i32_0 : i32, i32
  }
  func.func @transform_2(%arg0: i32, %arg1: i32) -> (i32, i32) {
    %c0_i32 = arith.constant 0 : i32
    %c0_i32_0 = arith.constant 0 : i32
    return %c0_i32, %arg1 : i32, i32
  }
  func.func @transform_3(%arg0: i32, %arg1: i32) -> (i32, i32) {
    %c0_i32 = arith.constant 0 : i32
    return %arg0, %arg1 : i32, i32
  }
}

module attributes {stable_mosaic.version = 11 : i64} {
  func.func @_rmsnorm_kernel(%arg0: i32, %arg1: memref<16x32xf32, #tpu.memory_space<vmem>>, %arg2: memref<1x32xf32, #tpu.memory_space<vmem>>, %arg3: memref<16x32xf32, #tpu.memory_space<vmem>>) attributes {dimension_semantics = [#tpu.dimension_semantics<parallel>], iteration_bounds = array<i64: 1>, scalar_prefetch = 0 : i64, scratch_operands = 0 : i64, tpu.core_type = #tpu.core_type<tc>, window_params = [{transform_indices = @transform_0, window_bounds = array<i64: 16, 32>}, {pipeline_mode = #tpu.pipeline_mode<synchronous>, transform_indices = @transform_1, window_bounds = array<i64: 1, 32>}, {transform_indices = @transform_2, window_bounds = array<i64: 16, 32>}]} {
    %c0 = arith.constant 0 : index
    %c0_0 = arith.constant 0 : index
    %0 = vector.load %arg1[%c0, %c0_0] : memref<16x32xf32, #tpu.memory_space<vmem>>, vector<16x32xf32>
    %1 = arith.mulf %0, %0 : vector<16x32xf32>
    %cst = arith.constant dense<0.000000e+00> : vector<16xf32>
    %2 = vector.multi_reduction <add>, %1, %cst [1] : vector<16x32xf32> to vector<16xf32>
    %3 = vector.shape_cast %2 : vector<16xf32> to vector<16x1xf32>
    %cst_1 = arith.constant 3.200000e+01 : f32
    %4 = vector.broadcast %cst_1 : f32 to vector<16x1xf32>
    %5 = arith.divf %3, %4 : vector<16x1xf32>
    %cst_2 = arith.constant 9.99999974E-6 : f32
    %6 = vector.broadcast %cst_2 : f32 to vector<16x1xf32>
    %7 = arith.addf %5, %6 : vector<16x1xf32>
    %8 = math.rsqrt %7 : vector<16x1xf32>
    %9 = vector.broadcast %8 : vector<16x1xf32> to vector<16x32xf32>
    %10 = arith.mulf %0, %9 : vector<16x32xf32>
    %c0_3 = arith.constant 0 : index
    %c0_4 = arith.constant 0 : index
    %11 = vector.load %arg2[%c0_3, %c0_4] : memref<1x32xf32, #tpu.memory_space<vmem>>, vector<1x32xf32>
    %12 = vector.broadcast %11 : vector<1x32xf32> to vector<16x32xf32>
    %13 = arith.mulf %10, %12 : vector<16x32xf32>
    %c0_5 = arith.constant 0 : index
    %c0_6 = arith.constant 0 : index
    %14 = vector.load %arg3[%c0_5, %c0_6] : memref<16x32xf32, #tpu.memory_space<vmem>>, vector<16x32xf32>
    tpu.vector_store %arg3[%c0_5, %c0_6], %13 {strides = array<i32>} : memref<16x32xf32, #tpu.memory_space<vmem>>, vector<16x32xf32>,
    return
  }
  func.func @transform_0(%arg0: i32) -> (i32, i32) {
    %c0_i32 = arith.constant 0 : i32
    %c0_i32_0 = arith.constant 0 : i32
    return %arg0, %c0_i32 : i32, i32
  }
  func.func @transform_1(%arg0: i32) -> (i32, i32) {
    %c0_i32 = arith.constant 0 : i32
    %c0_i32_0 = arith.constant 0 : i32
    %c0_i32_1 = arith.constant 0 : i32
    return %c0_i32, %c0_i32_0 : i32, i32
  }
  func.func @transform_2(%arg0: i32) -> (i32, i32) {
    %c0_i32 = arith.constant 0 : i32
    %c0_i32_0 = arith.constant 0 : i32
    return %arg0, %c0_i32 : i32, i32
  }
}

</mosaic_0001>

<bundles_post_ra>
// kernel: neg.1
= control target key start
LH: loop header
LB: loop body
LE: loop exit
PB: predicated region body
PF: predicated region fallthrough
CT: control target
= control target key end

     0   :  { %s24_s0 = inlined_call_operand.vmem [shape: f32[8,4], index: 0, kind: input, shape index: {}]   ;;  %s25_s1 = inlined_call_operand.vmem [shape: f32[8,4], index: 1, kind: output, shape index: {}]  }
   0x1   :  { %v2_v0 = vld [vmem:[%s24_s0] sm:$0xff] }
   0x2   :  { %v5_v1 = vxor.u32 2147483648, %v2_v0 }
   0x4   :  { %7 = vst [vmem:[%s25_s1] sm:$0xff] %v5_v1 }

// kernel: transformer_forward.11
= control target key start
LH: loop header
LB: loop body
LE: loop exit
PB: predicated region body
PF: predicated region fallthrough
CT: control target
= control target key end

     0   :  { %8 = vsyncpa [#allocation4], 0  ;;  %s282_s0 = inlined_call_operand.vmem [shape: f32[16,32], index: 0, kind: input, shape index: {}]   ;;  %s283_s1 = inlined_call_operand.hbm [shape: f32[1,32], index: 1, kind: input, shape index: {}]   ;;  %s284_s2 = inlined_call_operand.hbm [shape: bf16[32,64], index: 2, kind: input, shape index: {}]   ;;  %s285_s3 = inlined_call_operand.vmem [shape: bf16[16,64], index: 3, kind: output, shape index: {}]  }
   0x1   :  { %s17_s14 = sshll.u32 %s283_s1, 4  ;;  %s18_s14 = int_to_ptr.hbm [resolvable:$true] %s17_s14 }
   0x2   :  { %9 = vsyncpa [#allocation6], 0  ;;  %s236_s15 = smov [#allocation3]   ;;  %s27_s19 = sshll.u32 %s284_s2, 4  ;;  %s28_s19 = int_to_ptr.hbm [resolvable:$true] %s27_s19 }
   0x3   :  { %s19_s16 = sshll.u32 %s236_s15, 4  ;;  %s237_s20 = smov [#allocation5]   ;;  %s20_s16 = int_to_ptr.vmem [resolvable:$true] %s19_s16 }
   0x4   :  { %22 = dma.hbm_to_vmem [thread:$0]  %s18_s14, 16, %s20_s16, [#allocation4]  }
   0x5   :  { %s29_s21 = sshll.u32 %s237_s20, 4  ;;  %s238_s22 = smov 64   ;;  %s30_s21 = int_to_ptr.vmem [resolvable:$true] %s29_s21 }
   0x6   :  { %s239_s23 = smov 4  }
   0x7   :  { %35 = dma.hbm_to_vmem [thread:$0]  %s28_s19, 256, %s30_s21, [#allocation6], %s238_s22, %s238_s22, %s239_s23  }
   0x8   :  { %232 = dma.done.wait [#allocation4], 16  }
   0x9   :  { %233 = vsyncadd [#allocation4], 4294967280 }
   0xa   :  { %234 = dma.done.wait [#allocation6], 256  }
   0xb   :  { %235 = vsyncadd [#allocation6], 4294967040  ;;  %v49_v0 = vld [vmem:[%s282_s0] sm:$0xff]  ;;  %vm53_vm0 = vcmask 261120   ;;  %v50_v2 = vld [vmem:[%s282_s0 + $0x8] sm:$0xff]  ;;  %v240_v6 = vmov 32.0  }
   0xc   :  { %v51_v1 = vmul.f32 %v49_v0, %v49_v0  ;;  %v52_v4 = vmul.f32 %v50_v2, %v50_v2  ;;  %178 = vrcp.f32 %v240_v6  ;;  %v171_v16 = vld [vmem:[#allocation5 + $0x8] sm:$0xff]  ;;  %v170_v17 = vld [vmem:[#allocation5] sm:$0xff]  ;;  %v177_v29 = vld [vmem:[#allocation3] ss:$0 sm:$0xff]  ;;  %vm101_vm5 = vcmask 257024  }
   0xd   :  { %137 = vmatpush.bf16.msra.mxu0 %v171_v16  ;;  %vm147_vm9 = vcmask 519168  }
   0xe   :  { %v54_v3 = vsel %vm53_vm0, %v51_v1, 0.0  ;;  %v57_v5 = vsel %vm53_vm0, %v52_v4, 0.0 }
   0xf   :  { %55 = vadd.xlane.f32.xlu0 %v54_v3 }
  0x11   :  { %138 = vmatpush.bf16.msra.mxu0 %v170_v17 }
  0x12   :  { %v179_v7 = vpop.eup %178 }
  0x13   :  { %v61_v8 = vmul.f32 32.0, %v179_v7  ;;  %vm65_vm1 = vweird.f32 %v179_v7 }
  0x15   :  { %v62_v9 = vsub.f32 1.0, %v61_v8 }
  0x17   :  { %58 = vadd.xlane.f32.xlu0 %v57_v5  ;;  %v63_v10 = vmul.f32 %v179_v7, %v62_v9 }
  0x19   :  { %v64_v11 = vadd.f32 %v179_v7, %v63_v10 }
  0x1b   :  { %v66_v12 = vsel %vm65_vm1, %v179_v7, %v64_v11 }
  0x82   :  { %v56_v13 = vpop.xlane.xlu0 %55 }
  0x83   :  { %v67_v14 = vmul.f32 %v66_v12, %v56_v13 }
  0x85   :  { %v69_v15 = vadd.f32 1e-05, %v67_v14 }
  0x87   :  { %180 = vrsqrt.f32 %v69_v15  ;;  %vm77_vm3 = vweird.f32 %v69_v15 }
  0x8a   :  { %v59_v18 = vpop.xlane.xlu0 %58 }
  0x8b   :  { %v68_v19 = vmul.f32 %v66_v12, %v59_v18 }
  0x8d   :  { %v181_v20 = vpop.eup %180  ;;  %v70_v21 = vadd.f32 1e-05, %v68_v19 }
  0x8e   :  { %v72_v22 = vmul.f32 %v181_v20, %v69_v15  ;;  %vm78_vm2 = vweird.f32 %v181_v20 }
  0x8f   :  { %182 = vrsqrt.f32 %v70_v21  ;;  %vm79_vm4 = vmor %vm77_vm3, %vm78_vm2  ;;  %vm87_vm7 = vweird.f32 %v70_v21 }
  0x90   :  { %v73_v23 = vmul.f32 %v181_v20, %v72_v22 }
  0x92   :  { %v74_v24 = vmul.f32 0.5, %v73_v23 }
  0x94   :  { %v75_v25 = vsub.f32 1.5, %v74_v24 }
  0x95   :  { %v183_v26 = vpop.eup %182 }
  0x96   :  { %v76_v27 = vmul.f32 %v181_v20, %v75_v25  ;;  %v82_v28 = vmul.f32 %v183_v26, %v70_v21  ;;  %vm88_vm6 = vweird.f32 %v183_v26 }
  0x97   :  { %vm89_vm8 = vmor %vm87_vm7, %vm88_vm6 }
  0x98   :  { %v80_v30 = vsel %vm79_vm4, %v181_v20, %v76_v27  ;;  %v83_v31 = vmul.f32 %v183_v26, %v82_v28 }
  0x99   :  { %v91_v32 = vmul.f32 %v80_v30, %v49_v0 }
  0x9a   :  { %v84_v33 = vmul.f32 0.5, %v83_v31 }
  0x9b   :  { %v97_v34 = vmul.f32 %v177_v29, %v91_v32 }
  0x9c   :  { %v85_v35 = vsub.f32 1.5, %v84_v33 }
  0x9d   :  { %v99_v36 = vpack.c.bf16 %v97_v34, %v97_v34 }
  0x9e   :  { %v86_v37 = vmul.f32 %v183_v26, %v85_v35 }
  0x9f   :  { %102 = vst.msk [vmem:[#allocation2] sm:$0xf] %vm101_vm5, %v99_v36 }
  0xa0   :  { %v90_v38 = vsel %vm89_vm8, %v183_v26, %v86_v37 }
  0xa1   :  { %v92_v39 = vmul.f32 %v90_v38, %v50_v2 }
  0xa3   :  { %v98_v40 = vmul.f32 %v177_v29, %v92_v39 }
  0xa5   :  { %v100_v41 = vpack.c.bf16 %v98_v40, %v98_v40 }
  0xa7   :  { %103 = vst.msk [vmem:[#allocation2 + $0x4] sm:$0xf] %vm101_vm5, %v100_v41 }
  0xae   :  { %v169_v42 = vld [vmem:[#allocation2] sm:$0xff] }
  0xaf   :  { %168 = vmatmul.msk.bf16.vlgmr.msra.gmra.mxu0 %vm53_vm0, %v169_v42 }
 0x12c   :  { %v140_v43 = vpop.f32.mrf.mxu0 }
 0x12d   :  { %v145_v44 = vpack.c.bf16 %v140_v43, %v140_v43 }
 0x12f   :  { %148 = vst.msk [vmem:[%s285_s3] sm:$0xf] %vm147_vm9, %v145_v44 }
 0x134   :  { %v142_v45 = vpop.f32.mrf.mxu0 }
 0x135   :  { %v146_v46 = vpack.c.bf16 %v142_v45, %v142_v45 }
 0x137   :  { %149 = vst.msk [vmem:[%s285_s3 + $0x4] sm:$0xf] %vm147_vm9, %v146_v46 }
 0x138   :  { %154 = vsyncpa [#allocation4], 1 }
 0x139   :  { %155 = vsyncpa [#allocation6], 1 }

// kernel: transformer_forward.13
= control target key start
LH: loop header
LB: loop body
LE: loop exit
PB: predicated region body
PF: predicated region fallthrough
CT: control target
= control target key end

     0   :  { %vm19_vm0 = vcmask 261120   ;;  %v101_v1 = vmov 0.0   ;;  %s150_s1 = inlined_call_operand.vmem [shape: bf16[32,32], index: 1, kind: input, shape index: {}]   ;;  %s151_s0 = inlined_call_operand.vmem [shape: bf16[16,32], index: 0, kind: input, shape index: {}]   ;;  %s152_s2 = inlined_call_operand.vmem [shape: f32[16,32], index: 2, kind: input, shape index: {}]   ;;  %s153_s3 = inlined_call_operand.vmem [shape: f32[16,32], index: 3, kind: output, shape index: {}]  }
   0x1   :  { %v99_v0 = vld [vmem:[%s150_s1 + $0x8] sm:$0xff]  ;;  %20 = vst.msk [vmem:[#allocation2] sm:$0xff] %vm19_vm0, %v101_v1  ;;  %v98_v2 = vld [vmem:[%s150_s1] sm:$0xff] }
   0x2   :  { %21 = vst.msk [vmem:[#allocation2 + $0x8] sm:$0xff] %vm19_vm0, %v101_v1  ;;  %57 = vmatpush.bf16.msra.mxu0 %v99_v0  ;;  %v97_v3 = vld [vmem:[%s151_s0] sm:$0xff]  ;;  %v75_v13 = vld [vmem:[%s152_s2 + $0x8] sm:$0xff] }
   0x3   :  { %v74_v8 = vld [vmem:[%s152_s2] sm:$0xff] }
   0x6   :  { %58 = vmatpush.bf16.msra.mxu0 %v98_v2 }
   0x8   :  { %v22_v4 = vld [vmem:[#allocation2] sm:$0xff] }
   0x9   :  { %96 = vmatmul.msk.bf16.vlgmr.msra.gmra.mxu0 %vm19_vm0, %v97_v3  ;;  %v23_v7 = vld [vmem:[#allocation2 + $0x8] sm:$0xff] }
  0x86   :  { %v60_v5 = vpop.f32.mrf.mxu0 }
  0x87   :  { %v65_v6 = vadd.f32 %v60_v5, %v22_v4 }
  0x89   :  { %67 = vst.msk [vmem:[#allocation2] sm:$0xff] %vm19_vm0, %v65_v6 }
  0x8e   :  { %v62_v9 = vpop.f32.mrf.mxu0 }
  0x8f   :  { %v66_v10 = vadd.f32 %v62_v9, %v23_v7 }
  0x90   :  { %v72_v11 = vld [vmem:[#allocation2] sm:$0xff] }
  0x91   :  { %v76_v12 = vadd.f32 %v74_v8, %v72_v11  ;;  %68 = vst.msk [vmem:[#allocation2 + $0x8] sm:$0xff] %vm19_vm0, %v66_v10 }
  0x93   :  { %78 = vst.msk [vmem:[%s153_s3] sm:$0xff] %vm19_vm0, %v76_v12 }
  0x98   :  { %v73_v14 = vld [vmem:[#allocation2 + $0x8] sm:$0xff] }
  0x99   :  { %v77_v15 = vadd.f32 %v75_v13, %v73_v14 }
  0x9b   :  { %79 = vst.msk [vmem:[%s153_s3 + $0x8] sm:$0xff] %vm19_vm0, %v77_v15 }

// kernel: transformer_forward.14
= control target key start
LH: loop header
LB: loop body
LE: loop exit
PB: predicated region body
PF: predicated region fallthrough
CT: control target
= control target key end

     0   :  { %vm26_vm0 = vcmask 261120   ;;  %v244_v6 = vmov 32.0   ;;  %vm74_vm5 = vcmask 257024   ;;  %vm192_vm14 = vcmask 781312   ;;  %s301_s0 = inlined_call_operand.vmem [shape: f32[16,32], index: 0, kind: input, shape index: {}]   ;;  %s302_s1 = inlined_call_operand.vmem [shape: f32[1,32], index: 1, kind: input, shape index: {}]   ;;  %s303_s2 = inlined_call_operand.vmem [shape: bf16[32,96], index: 2, kind: input, shape index: {}]   ;;  %s304_s3 = inlined_call_operand.vmem [shape: bf16[32,96], index: 3, kind: input, shape index: {}]   ;;  %s305_s4 = inlined_call_operand.vmem [shape: bf16[16,96], index: 4, kind: output, shape index: {}]  }
   0x1   :  { %v22_v0 = vld [vmem:[%s301_s0] sm:$0xff]  ;;  %v23_v2 = vld [vmem:[%s301_s0 + $0x8] sm:$0xff]  ;;  %230 = vrcp.f32 %v244_v6 }
   0x2   :  { %v24_v1 = vmul.f32 %v22_v0, %v22_v0  ;;  %v25_v4 = vmul.f32 %v23_v2, %v23_v2  ;;  %v225_v16 = vld [vmem:[%s303_s2 + $0x8] sm:$0xff]  ;;  %v224_v18 = vld [vmem:[%s303_s2] sm:$0xff] }
   0x3   :  { %v227_v17 = vld [vmem:[%s304_s3 + $0x8] sm:$0xff]  ;;  %110 = vmatpush.bf16.msra.mxu0 %v225_v16  ;;  %v226_v19 = vld [vmem:[%s304_s3] sm:$0xff] }
   0x4   :  { %v27_v3 = vsel %vm26_vm0, %v24_v1, 0.0  ;;  %v30_v5 = vsel %vm26_vm0, %v25_v4, 0.0  ;;  %140 = vmatpush.bf16.msra.mxu1 %v227_v17  ;;  %v229_v31 = vld [vmem:[%s302_s1] ss:$0 sm:$0xff] }
   0x5   :  { %28 = vadd.xlane.f32.xlu0 %v27_v3 }
   0x7   :  { %v231_v7 = vpop.eup %230  ;;  %111 = vmatpush.bf16.msra.mxu0 %v224_v18 }
   0x8   :  { %v34_v8 = vmul.f32 32.0, %v231_v7  ;;  %vm38_vm1 = vweird.f32 %v231_v7  ;;  %141 = vmatpush.bf16.msra.mxu1 %v226_v19 }
   0xa   :  { %v35_v9 = vsub.f32 1.0, %v34_v8 }
   0xc   :  { %v36_v10 = vmul.f32 %v231_v7, %v35_v9 }
   0xd   :  { %31 = vadd.xlane.f32.xlu0 %v30_v5 }
   0xe   :  { %v37_v11 = vadd.f32 %v231_v7, %v36_v10 }
  0x10   :  { %v39_v12 = vsel %vm38_vm1, %v231_v7, %v37_v11 }
  0x78   :  { %v29_v13 = vpop.xlane.xlu0 %28 }
  0x79   :  { %v40_v14 = vmul.f32 %v39_v12, %v29_v13 }
  0x7b   :  { %v42_v15 = vadd.f32 1e-05, %v40_v14 }
  0x7d   :  { %232 = vrsqrt.f32 %v42_v15  ;;  %vm50_vm3 = vweird.f32 %v42_v15 }
  0x80   :  { %v32_v20 = vpop.xlane.xlu0 %31 }
  0x81   :  { %v41_v21 = vmul.f32 %v39_v12, %v32_v20 }
  0x83   :  { %v233_v22 = vpop.eup %232  ;;  %v43_v23 = vadd.f32 1e-05, %v41_v21 }
  0x84   :  { %v45_v24 = vmul.f32 %v233_v22, %v42_v15  ;;  %vm51_vm2 = vweird.f32 %v233_v22 }
  0x85   :  { %234 = vrsqrt.f32 %v43_v23  ;;  %vm52_vm4 = vmor %vm50_vm3, %vm51_vm2  ;;  %vm60_vm7 = vweird.f32 %v43_v23 }
  0x86   :  { %v46_v25 = vmul.f32 %v233_v22, %v45_v24 }
  0x88   :  { %v47_v26 = vmul.f32 0.5, %v46_v25 }
  0x8a   :  { %v48_v27 = vsub.f32 1.5, %v47_v26 }
  0x8b   :  { %v235_v28 = vpop.eup %234 }
  0x8c   :  { %v49_v29 = vmul.f32 %v233_v22, %v48_v27  ;;  %v55_v30 = vmul.f32 %v235_v28, %v43_v23  ;;  %vm61_vm6 = vweird.f32 %v235_v28 }
  0x8d   :  { %vm62_vm8 = vmor %vm60_vm7, %vm61_vm6 }
  0x8e   :  { %v53_v32 = vsel %vm52_vm4, %v233_v22, %v49_v29  ;;  %v56_v33 = vmul.f32 %v235_v28, %v55_v30 }
  0x8f   :  { %v64_v34 = vmul.f32 %v53_v32, %v22_v0 }
  0x90   :  { %v57_v35 = vmul.f32 0.5, %v56_v33 }
  0x91   :  { %v70_v36 = vmul.f32 %v229_v31, %v64_v34 }
  0x92   :  { %v58_v37 = vsub.f32 1.5, %v57_v35 }
  0x93   :  { %v72_v38 = vpack.c.bf16 %v70_v36, %v70_v36 }
  0x94   :  { %v59_v39 = vmul.f32 %v235_v28, %v58_v37 }
  0x95   :  { %75 = vst.msk [vmem:[#allocation2] sm:$0xf] %vm74_vm5, %v72_v38 }
  0x96   :  { %v63_v40 = vsel %vm62_vm8, %v235_v28, %v59_v39 }
  0x97   :  { %v65_v41 = vmul.f32 %v63_v40, %v23_v2 }
  0x99   :  { %v71_v42 = vmul.f32 %v229_v31, %v65_v41 }
  0x9b   :  { %v73_v43 = vpack.c.bf16 %v71_v42, %v71_v42 }
  0x9d   :  { %76 = vst.msk [vmem:[#allocation2 + $0x4] sm:$0xf] %vm74_vm5, %v73_v43 }
  0xa4   :  { %v223_v44 = vld [vmem:[#allocation2] sm:$0xff] }
  0xa5   :  { %211 = vmatmul.msk.bf16.vlgmr.msra.gmra.mxu0 %vm26_vm0, %v223_v44  ;;  %220 = vmatmul.msk.bf16.vlgmr.msra.gmra.mxu1 %vm26_vm0, %v223_v44 }
 0x122   :  { %v113_v45 = vpop.f32.mrf.mxu0  ;;  %v143_v1 = vpop.f32.mrf.mxu1 }
 0x123   :  { %v221_v46 = vmul.f32 -1.442695, %v113_v45 }
 0x125   :  { %236 = vpow2.f32 %v221_v46 }
 0x12a   :  { %v115_v47 = vpop.f32.mrf.mxu0  ;;  %v145_v14 = vpop.f32.mrf.mxu1 }
 0x12b   :  { %v237_v48 = vpop.eup %236  ;;  %v222_v49 = vmul.f32 -1.442695, %v115_v47 }
 0x12c   :  { %v154_v50 = vadd.f32 1.0, %v237_v48 }
 0x12d   :  { %238 = vpow2.f32 %v222_v49 }
 0x12e   :  { %240 = vrcp.f32 %v154_v50  ;;  %v167_v56 = vand.u32 2147483648, %v154_v50  ;;  %v165_v58 = vand.u32 2147483647, %v154_v50  ;;  %vm161_vm10 = vweird.f32 %v154_v50 }
 0x130   :  { %v168_v61 = vor.u32 1.1754944e-38, %v167_v56  ;;  %vm166_vm12 = vcmp.eq.f32.partialorder %v165_v58, 8.507059e+37 }
 0x133   :  { %v239_v51 = vpop.eup %238 }
 0x134   :  { %v241_v52 = vpop.eup %240  ;;  %v155_v53 = vadd.f32 1.0, %v239_v51 }
 0x135   :  { %v157_v54 = vmul.f32 %v241_v52, %v154_v50  ;;  %vm162_vm9 = vweird.f32 %v241_v52 }
 0x136   :  { %242 = vrcp.f32 %v155_v53  ;;  %vm163_vm11 = vmor %vm161_vm10, %vm162_vm9  ;;  %v182_v4 = vand.u32 2147483648, %v155_v53  ;;  %v180_v7 = vand.u32 2147483647, %v155_v53  ;;  %vm176_vm15 = vweird.f32 %v155_v53 }
 0x137   :  { %v158_v55 = vsub.f32 1.0, %v157_v54 }
 0x138   :  { %v183_v10 = vor.u32 1.1754944e-38, %v182_v4  ;;  %vm181_vm1 = vcmp.eq.f32.partialorder %v180_v7, 8.507059e+37 }
 0x139   :  { %v159_v57 = vmul.f32 %v241_v52, %v158_v55 }
 0x13b   :  { %v160_v59 = vadd.f32 %v241_v52, %v159_v57 }
 0x13c   :  { %v243_v60 = vpop.eup %242 }
 0x13d   :  { %v164_v62 = vsel %vm163_vm11, %v241_v52, %v160_v59  ;;  %v172_v63 = vmul.f32 %v243_v60, %v155_v53  ;;  %vm177_vm13 = vweird.f32 %v243_v60 }
 0x13e   :  { %v169_v0 = vsel %vm166_vm12, %v168_v61, %v164_v62  ;;  %vm178_vm0 = vmor %vm176_vm15, %vm177_vm13 }
 0x13f   :  { %v186_v2 = vmul.f32 %v169_v0, %v113_v45  ;;  %v173_v3 = vsub.f32 1.0, %v172_v63 }
 0x141   :  { %v188_v5 = vmul.f32 %v186_v2, %v143_v1  ;;  %v174_v6 = vmul.f32 %v243_v60, %v173_v3 }
 0x143   :  { %v190_v8 = vpack.c.bf16 %v188_v5, %v188_v5  ;;  %v175_v9 = vadd.f32 %v243_v60, %v174_v6 }
 0x145   :  { %193 = vst.msk [vmem:[%s305_s4] sm:$0xf] %vm192_vm14, %v190_v8  ;;  %v179_v11 = vsel %vm178_vm0, %v243_v60, %v175_v9 }
 0x146   :  { %v184_v12 = vsel %vm181_vm1, %v183_v10, %v179_v11 }
 0x147   :  { %v187_v13 = vmul.f32 %v184_v12, %v115_v47 }
 0x149   :  { %v189_v15 = vmul.f32 %v187_v13, %v145_v14 }
 0x14b   :  { %v191_v16 = vpack.c.bf16 %v189_v15, %v189_v15 }
 0x14d   :  { %194 = vst.msk [vmem:[%s305_s4 + $0x4] sm:$0xf] %vm192_vm14, %v191_v16 }

// kernel: transformer_forward.12
= control target key start
LH: loop header
LB: loop body
LE: loop exit
PB: predicated region body
PF: predicated region fallthrough
CT: control target
= control target key end

     0   :  { %s1360_s24 = smov 0   ;;  %s1362_s25 = smov 0   ;;  %s1545_s0 = inlined_call_operand.vmem [shape: bf16[2,8,32], index: 0, kind: input, shape index: {}]   ;;  %s1546_s1 = inlined_call_operand.vmem [shape: bf16[2,8,16], index: 1, kind: input, shape index: {}]   ;;  %s1547_s2 = inlined_call_operand.vmem [shape: bf16[2,8,16], index: 2, kind: input, shape index: {}]   ;;  %s1548_s3 = inlined_call_operand.vmem [shape: f32[8,8], index: 3, kind: input, shape index: {}, may-alias: {3,5}]   ;;  %s1549_s4 = inlined_call_operand.vmem [shape: f32[8,8], index: 4, kind: input, shape index: {}, may-alias: {4,6}]   ;;  %s1550_s5 = inlined_call_operand.vmem [shape: f32[8,8], index: 5, kind: input, shape index: {}, may-alias: {3,5}]   ;;  %s1551_s6 = inlined_call_operand.vmem [shape: f32[8,8], index: 6, kind: input, shape index: {}, may-alias: {4,6}]   ;;  %s1552_s7 = inlined_call_operand.vmem [shape: bf16[2,8,32], index: 7, kind: output, shape index: {}]  }
   0x1   :  { %s1364_s26 = smov 0  }
   0x2 LB: > { %s36_s27 = sadd.s32 1, %s1297_s25  ;;  %p1183_p0 = scmp.ge.s32.totalorder %s1301_s26, 1  ;;  %s1301_s26 = sphi %s1364_s26, %s17_s26   ;;  %s1297_s25 = sphi %s1362_s25, %s1554_s25   ;;  %s1293_s24 = sphi %s1360_s24, %s1553_s24  }
   0x3   : > { %p38_p1 = scmp.ge.s32.totalorder %s36_s27, 2  ;;  %p326_p2 = scmp.lt.s32.totalorder %s1301_s26, 3 }
   0x5   : > { %s1556_s27 = smov (%p38_p1, %s36_s27), 0  ;;  %p327_p3 = pnand %p1183_p0, %p326_p2 }
   0x6   : > { %p392_p4 = scmp.lt.s32.totalorder (!%p327_p3), %s1293_s24, 1  ;;  %s1303_s12 = smov (!%p327_p3), 124  }
   0x7   : > { %330 = sbr.rel (%p327_p3) target bundleno = 1173 (0x495), region = 48  ;;  %s1304_s13 = smov (!%p327_p3), 116  }
   0x8   : > { %s1305_s14 = smov (!%p327_p3), 4   ;;  %s1306_s15 = smov (!%p327_p3), 100  }
   0x9   : > { %s1307_s16 = smov (!%p327_p3), 108   ;;  %s1308_s19 = smov (!%p327_p3), 8  }
   0xa   : > { %s1310_s29 = smov (!%p327_p3), 24   ;;  %s1311_s9 = smov (!%p327_p3), 120  }
   0xb   : > { %s1312_s10 = smov (!%p327_p3), 112  }
   0xc   : > { %s1558_s24 = smov (!%p392_p4, %s1293_s24), 1  ;;  %v457_v15 = vld [vmem:[%s1548_s3] sm:$0xff]  ;;  %vm441_vm0 = vcmask 31744   ;;  %vm492_vm1 = vcmask 64512   ;;  %v446_v62 = vlaneseq  ;;  %vm535_vm3 = vcmask 7168  }
   0xd   : > { %s1378_s28 = sshll.u32 %s1558_s24, 2  ;;  %v458_v16 = vld [vmem:[%s1549_s4] sm:$0xff]  ;;  %s1309_s24 = smov 16   ;;  %vm548_vm4 = vcmask 1043456   ;;  %vm633_vm5 = vcmask 15368   ;;  %vm444_vm6 = vcmask 261120  }
   0xe   : > { %s405_s8 = scalar_lea.vmem %s1546_s1, %s1378_s28  ;;  %s398_s11 = scalar_lea.vmem %s1545_s0, %s1378_s28  ;;  %v459_v20 = vld [vmem:[%s1550_s5] sm:$0xff]  ;;  %v1435_v63 = vshrl.u32 %v446_v62, 7  ;;  %vm760_vm7 = vcmask 23568   ;;  %vm866_vm8 = vcmask 31768   ;;  %vm664_vm9 = vcmask 130112  }
   0xf   : > { %v461_v0 = vld [vmem:[%s405_s8] sm:$0xf]  ;;  %vm799_vm14 = vcmask 195712   ;;  %vm897_vm15 = vcmask 261312   ;;  %s435_s17 = scalar_lea.vmem %s1552_s7, %s1378_s28 }
  0x10   : > { %v568_v1 = vld [vmem:[%s398_s11] sm:$0xf]  ;;  %v462_v2 = vunpack.c.l.bf16 %v461_v0  ;;  %v1437_v0 = vand.u32 127, %v446_v62 }
  0x11   : > { %v1388_v3 = vunpack.c.l.bf16 %v568_v1  ;;  %v477_v4 = vld [vmem:[%s398_s11] sm:$0xf] }
  0x12   : > { %v478_v5 = vunpack.c.l.bf16 %v477_v4  ;;  %464 = vrot.lane.b32.xlu0 %v462_v2, %s1303_s12  ;;  %v667_v6 = vld [vmem:[%s405_s8] sm:$0xf]  ;;  %v472_v25 = vmul.f32 %v462_v2, %v459_v20  ;;  %vm456_vm2 = vcmp.eq.s32.totalorder %v1437_v0, %v1435_v63 }
  0x13   : > { %571 = vrot.lane.b32.xlu2 %v1388_v3, %s1304_s13  ;;  %v690_v7 = vld [vmem:[%s398_s11] sm:$0xf]  ;;  %v1391_v8 = vunpack.c.l.bf16 %v667_v6 }
  0x14   : > { %480 = vrot.lane.b32.xlu1 %v478_v5, %s1303_s12  ;;  %v1394_v9 = vunpack.c.l.bf16 %v690_v7  ;;  %v802_v11 = vld [vmem:[%s398_s11] sm:$0xf]  ;;  %v487_v30 = vmul.f32 %v478_v5, %v457_v15  ;;  %s1313_s11 = smov 104  }
  0x15   : > { %v1399_v12 = vunpack.c.l.bf16 %v802_v11  ;;  %v460_v23 = vld [vmem:[%s1551_s6] sm:$0xff] }
  0x16   : > { %v1239_v10 = vpack.i.bf16 %v1394_v9, %v1391_v8 }
  0x17   : > { %v1244_v13 = vpack.i.bf16 %v1399_v12, %v1394_v9 }
  0x1a   : > { %467 = vrot.lane.b32.xlu0 %v462_v2, %s1305_s14 }
  0x1b   : > { %574 = vrot.lane.b32.xlu2 %v1388_v3, %s1303_s12 }
  0x1c   : > { %483 = vrot.lane.b32.xlu1 %v478_v5, %s1305_s14  ;;  %s1459_s14 = scalar_lea.vmem %s1547_s2, %s1378_s28 }
  0x22   : > { %1240 = vrot.lane.b32.xlu0 %v1239_v10, %s1304_s13 }
  0x23   : > { %1245 = vrot.lane.b32.xlu2 %v1244_v13, %s1307_s16 }
  0x24   : > { %673 = vrot.lane.b32.xlu1 %v1391_v8, %s1303_s12 }
  0x2a   : > { %805 = vrot.lane.b32.xlu0 %v1399_v12, %s1306_s15 }
  0x2b   : > { %579 = vrot.lane.b32.xlu2 %v457_v15, %s1308_s19 }
  0x33   : > { %678 = vrot.lane.b32.xlu2 %v459_v20, %s1308_s19 }
  0x3b   : > { %700 = vrot.lane.b32.xlu2 %v457_v15, %s1309_s24 }
  0x43   : > { %812 = vrot.lane.b32.xlu2 %v457_v15, %s1310_s29 }
  0x6d   : > { %v572_v14 = vpop.permute.xlu2 %571 }
  0x75   : > { %v575_v17 = vpop.permute.xlu2 %574 }
  0x76   : > { %v577_v18 = vsel %vm441_vm0, %v572_v14, %v575_v17 }
  0x77   : > { %v583_v19 = vmul.f32 %v577_v18, %v458_v16 }
  0x79   : > { %585 = vrot.lane.b32.xlu0 %v583_v19, %s1308_s19  ;;  %v1314_v19 = vmov -1e+30  }
  0x7a   : > { %442 = vst.msk [vmem:[#allocation2] sm:$0xff] %vm441_vm0, %v1314_v19 }
  0x7d   : > { %v1246_v44 = vpop.permute.xlu2 %1245 }
  0x7e   : > { %v1247_v45 = vunpack.i.l.bf16 %v1246_v44  ;;  %v1248_v48 = vunpack.i.h.bf16 %v1246_v44 }
  0x84   : > { %v465_v21 = vpop.permute.xlu0 %464 }
  0x85   : > { %v580_v52 = vpop.permute.xlu2 %579 }
  0x86   : > { %v481_v22 = vpop.permute.xlu1 %480  ;;  %v582_v53 = vmul.f32 %v580_v52, %v1388_v3 }
  0x8c   : > { %v468_v24 = vpop.permute.xlu0 %467 }
  0x8d   : > { %v471_v26 = vsel %vm441_vm0, %v465_v21, %v468_v24  ;;  %v679_v58 = vpop.permute.xlu2 %678  ;;  %v513_v21 = vld [vmem:[#allocation2] sm:$0xff] }
  0x8e   : > { %v484_v27 = vpop.permute.xlu1 %483  ;;  %v473_v28 = vmul.f32 %v471_v26, %v460_v23  ;;  %v681_v59 = vmul.f32 %v679_v58, %v1391_v8  ;;  %v476_v26 = vld [vmem:[%s1459_s14] sm:$0xf] }
  0x8f   : > { %v486_v29 = vsel %vm441_vm0, %v481_v22, %v484_v27  ;;  %v550_v27 = vsel %vm548_vm4, %v476_v26, 0 }
  0x90   : > { %v488_v31 = vmul.f32 %v486_v29, %v458_v16  ;;  %v474_v32 = vadd.f32 %v473_v28, %v472_v25  ;;  %559 = vmatpush.bf16.msra.mxu1 %v550_v27  ;;  %653 = vmatpush.bf16.msra.mxu3 %v550_v27 }
  0x92   : > { %v475_v33 = vpack.c.bf16 %v474_v32, %v474_v32  ;;  %v489_v34 = vadd.f32 %v488_v31, %v487_v30 }
  0x94   : > { %v497_v35 = vsel %vm492_vm1, %v475_v33, 0  ;;  %v1241_v36 = vpop.permute.xlu0 %1240  ;;  %v490_v39 = vmul.f32 0.35355338, %v489_v34 }
  0x95   : > { %506 = vmatpush.bf16.xpose.msra.mxu0 %v497_v35  ;;  %604 = vmatpush.bf16.xpose.msra.mxu2 %v497_v35  ;;  %v1242_v37 = vunpack.i.l.bf16 %v1241_v36  ;;  %v1243_v43 = vunpack.i.h.bf16 %v1241_v36  ;;  %v701_v5 = vpop.permute.xlu2 %700 }
  0x96   : > { %v674_v38 = vpop.permute.xlu1 %673  ;;  %v491_v42 = vpack.c.bf16 %v490_v39, %v490_v39  ;;  %v703_v6 = vmul.f32 %v701_v5, %v1394_v9  ;;  %v1315_v9 = vmov 0   ;;  %v1319_v5 = vmov 3  }
  0x97   : > { %v676_v40 = vsel %vm441_vm0, %v1242_v37, %v674_v38  ;;  %v699_v46 = vsel %vm441_vm0, %v1247_v45, %v1243_v43  ;;  %1249 = vset.pattern.permute.xlu2 %v1315_v9  ;;  %1253 = vset.pattern.permute.xlu1 %v1315_v9 }
  0x98   : > { %v682_v41 = vmul.f32 %v676_v40, %v460_v23  ;;  %v704_v47 = vmul.f32 %v699_v46, %v458_v16 }
  0x9a   : > { %684 = vrot.lane.b32.xlu0 %v682_v41, %s1308_s19  ;;  %v1317_v41 = vmov 1  }
  0x9c   : > { %1188 = vmatmul.msk.bf16.vlgmr.msra.gmra.mxu0 %vm492_vm1, %v491_v42  ;;  %v806_v49 = vpop.permute.xlu0 %805 }
  0x9d   : > { %v811_v50 = vsel %vm441_vm0, %v806_v49, %v1248_v48  ;;  %v813_v13 = vpop.permute.xlu2 %812 }
  0x9e   : > { %v816_v51 = vmul.f32 %v811_v50, %v458_v16  ;;  %v815_v14 = vmul.f32 %v813_v13, %v1399_v12  ;;  %v1316_v12 = vmov 0.0  }
  0x9f   : > { %443 = vst.msk [vmem:[#allocation3] sm:$0xff] %vm441_vm0, %v1316_v12  ;;  %vm927_vm0 = vcmask 60416  }
  0xa0   : > { %445 = vst.msk [vmem:[#allocation4] sm:$0xff] %vm444_vm6, %v1316_v12 }
  0xa2   : > { %706 = vrot.lane.b32.xlu0 %v704_v47, %s1309_s24 }
  0xaa   : > { %818 = vrot.lane.b32.xlu0 %v816_v51, %s1310_s29 }
  0xeb   : > { %v586_v54 = vpop.permute.xlu0 %585 }
  0xec   : > { %v588_v55 = vadd.f32 %v586_v54, %v582_v53  ;;  %v689_v54 = vld [vmem:[%s1459_s14] sm:$0xf] }
  0xee   : > { %v589_v56 = vmul.f32 0.35355338, %v588_v55  ;;  %v771_v55 = vunpack.c.l.b16 %v689_v54 }
  0xf0   : > { %v590_v57 = vpack.c.bf16 %v589_v56, %v589_v56 }
  0xf2   : > { %592 = vrot.lane.b32.xlu0 %v590_v57, %s1311_s9  ;;  %v772_v57 = vpack.c.b16 %v771_v55, %v771_v55 }
 0x10c   : > { %v685_v60 = vpop.permute.xlu0 %684 }
 0x10d   : > { %v687_v61 = vadd.f32 %v685_v60, %v681_v59 }
 0x10f   : > { %v688_v25 = vpack.c.bf16 %v687_v61, %v687_v61 }
 0x114   : > { %v707_v7 = vpop.permute.xlu0 %706 }
 0x115   : > { %v709_v8 = vadd.f32 %v707_v7, %v703_v6 }
 0x117   : > { %v710_v10 = vmul.f32 0.35355338, %v709_v8 }
 0x119   : > { %v508_v1 = vpop.f32.mrf.mxu0  ;;  %v711_v11 = vpack.c.bf16 %v710_v10, %v710_v10 }
 0x11a   : > { %v512_v2 = vsel %vm456_vm2, -inf, %v508_v1 }
 0x11b   : > { %v514_v3 = vsel %vm492_vm1, %v512_v2, -inf }
 0x11c   : > { %515 = vmax.xlane.f32.xlu1 %v514_v3  ;;  %v819_v15 = vpop.permute.xlu0 %818 }
 0x11d   : > { %v821_v16 = vadd.f32 %v819_v15, %v815_v14 }
 0x11f   : > { %v822_v17 = vmul.f32 0.35355338, %v821_v16 }
 0x121   : > { %v510_v4 = vpop.f32.mrf.mxu0  ;;  %v823_v18 = vpack.c.bf16 %v822_v17, %v822_v17  ;;  %v537_v17 = vld [vmem:[#allocation4] sm:$0xff] }
 0x122   : > { %v1318_v4 = vmov 2  }
 0x123   : > { %825 = vrot.lane.b32.xlu0 %v823_v18, %s1313_s11 }
 0x124   : > { %1251 = vset.pattern.permute.xlu0 %v1318_v4 }
 0x135   : > { %713 = vrot.lane.b32.xlu1 %v711_v11, %s1312_s10 }
 0x164   : > { %v593_v20 = vpop.permute.xlu0 %592 }
 0x165   : > { %1190 = vmatmul.msk.bf16.vlgmr.msra.gmra.mxu2 %vm492_vm1, %v593_v20 }
 0x18f   : > { %v516_v22 = vpop.xlane.xlu1 %515 }
 0x190   : > { %v517_v23 = vmax.f32 %v513_v21, %v516_v22 }
 0x192   : > { %v518_v24 = vsub.f32 %v513_v21, %v517_v23  ;;  %567 = vst.msk [vmem:[#allocation2] sm:$0xff] %vm535_vm3, %v517_v23  ;;  %523 = vperm.xlu2 %1249, %v517_v23  }
 0x194   : > { %v519_v58 = vmul.f32 1.442695, %v518_v24 }
 0x195   : > { %v826_v39 = vpop.permute.xlu0 %825 }
 0x199   : > { %v611_v43 = vld [vmem:[#allocation2] sm:$0xff] }
 0x19a   : > { %716 = vrot.lane.b32.xlu2 %v688_v25, %s1311_s9 }
 0x19b   : > { %1250 = vset.pattern.permute.xlu2 %v1317_v41 }
 0x1a7   : > { %v714_v40 = vpop.permute.xlu1 %713 }
 0x1e8   : > { %v606_v28 = vpop.f32.mrf.mxu2 }
 0x1e9   : > { %v610_v29 = vsel %vm456_vm2, -inf, %v606_v28 }
 0x1ea   : > { %v612_v30 = vsel %vm492_vm1, %v610_v29, -inf }
 0x1eb   : > { %613 = vmax.xlane.f32.xlu2 %v612_v30 }
 0x1ec   : > { %v524_v31 = vpop.permute.xlu2 %523 }
 0x1ed   : > { %v526_v32 = vsub.f32 %v512_v2, %v524_v31 }
 0x1ef   : > { %v527_v33 = vmul.f32 1.442695, %v526_v32 }
 0x1f0   : > { %v608_v34 = vpop.f32.mrf.mxu2 }
 0x1f1   : > { %1261 = vpow2.f32 %v527_v33 }
 0x1f2   : > { %1263 = vpow2.f32 %v519_v58 }
 0x1f4   : > { %v717_v35 = vpop.permute.xlu2 %716 }
 0x1f5   : > { %v722_v36 = vsel %vm492_vm1, %v717_v35, 0 }
 0x1f6   : > { %731 = vmatpush.bf16.xpose.msrb.mxu1 %v722_v36  ;;  %837 = vmatpush.bf16.xpose.msrb.mxu0 %v722_v36 }
 0x1f7   : > { %v1468_v37 = vpop.eup %1261 }
 0x1f8   : > { %v544_v38 = vpack.c.bf16 %v1468_v37, %v1468_v37  ;;  %v1493_v61 = vpop.eup %1263  ;;  %v531_v12 = vsel %vm492_vm1, %v1468_v37, 0.0 }
 0x1fa   : > { %1189 = vmatmul.msk.bf16.vlgmr.msra.gmra.mxu1 %vm492_vm1, %v544_v38 }
 0x1fd   : > { %1194 = vmatmul.msk.bf16.vlgmr.msrb.gmra.mxu0 %vm492_vm1, %v826_v39 }
 0x20a   : > { %1192 = vmatmul.msk.bf16.vlgmr.msrb.gmra.mxu1 %vm492_vm1, %v714_v40  ;;  %v529_v40 = vld [vmem:[#allocation3] sm:$0xff] }
 0x25e   : > { %v614_v42 = vpop.xlane.xlu2 %613 }
 0x25f   : > { %v615_v44 = vmax.f32 %v611_v43, %v614_v42 }
 0x261   : > { %666 = vst.msk [vmem:[#allocation2] sm:$0xff] %vm633_vm5, %v615_v44  ;;  %621 = vperm.xlu2 %1250, %v615_v44   ;;  %v616_v59 = vsub.f32 %v611_v43, %v615_v44 }
 0x263   : > { %v617_v60 = vmul.f32 1.442695, %v616_v59 }
 0x265   : > { %1265 = vpow2.f32 %v617_v60 }
 0x268   : > { %v738_v6 = vld [vmem:[#allocation2] sm:$0xff] }
 0x269   : > { %1252 = vset.pattern.permute.xlu2 %v1319_v5 }
 0x26b   : > { %v1496_v62 = vpop.eup %1265 }
 0x277   : > { %v561_v45 = vpop.f32.mrf.mxu1 }
 0x27a   : > { %v839_v46 = vpop.f32.mrf.mxu0 }
 0x27b   : > { %v1480_v47 = vsel %vm456_vm2, -inf, %v839_v46 }
 0x27c   : > { %v845_v48 = vsel %vm492_vm1, %v1480_v47, -inf }
 0x27d   : > { %846 = vmax.xlane.f32.xlu1 %v845_v48 }
 0x27f   : > { %v563_v49 = vpop.f32.mrf.mxu1 }
 0x282   : > { %v841_v50 = vpop.f32.mrf.mxu0 }
 0x287   : > { %v733_v51 = vpop.f32.mrf.mxu1 }
 0x288   : > { %v1487_v52 = vsel %vm456_vm2, -inf, %v733_v51  ;;  %vm979_vm2 = vcmask 191616  }
 0x289   : > { %v739_v53 = vsel %vm492_vm1, %v1487_v52, -inf }
 0x28a   : > { %740 = vmax.xlane.f32.xlu0 %v739_v53 }
 0x28f   : > { %v735_v56 = vpop.f32.mrf.mxu1 }
 0x296   : > { %773 = vrot.lane.b32.xlu1 %v772_v57, %s1311_s9 }
 0x29e   : > { %540 = vperm.xlu1 %1253, %v1493_v61  }
 0x2a6   : > { %1254 = vset.pattern.permute.xlu1 %v1317_v41 }
 0x2a7   : > { %638 = vperm.xlu1 %1254, %v1496_v62  }
 0x2af   : > { %1257 = vset.pattern.permute.xlu1 %v1315_v9 }
 0x2bb   : > { %v622_v63 = vpop.permute.xlu2 %621 }
 0x2bc   : > { %v624_v0 = vsub.f32 %v610_v29, %v622_v63 }
 0x2be   : > { %v625_v1 = vmul.f32 1.442695, %v624_v0 }
 0x2c0   : > { %1267 = vpow2.f32 %v625_v1 }
 0x2c6   : > { %v1268_v2 = vpop.eup %1267 }
 0x2c7   : > { %v642_v3 = vpack.c.bf16 %v1268_v2, %v1268_v2  ;;  %v629_v9 = vsel %vm492_vm1, %v1268_v2, 0.0 }
 0x2c9   : > { %1191 = vmatmul.msk.bf16.vlgmr.msra.gmra.mxu3 %vm492_vm1, %v642_v3 }
 0x2f0   : > { %v847_v10 = vpop.xlane.xlu1 %846 }
 0x2fd   : > { %v741_v7 = vpop.xlane.xlu0 %740 }
 0x2fe   : > { %v742_v8 = vmax.f32 %v738_v6, %v741_v7 }
 0x300   : > { %v743_v11 = vsub.f32 %v738_v6, %v742_v8  ;;  %801 = vst.msk [vmem:[#allocation2] sm:$0xff] %vm760_vm7, %v742_v8  ;;  %748 = vperm.xlu0 %1251, %v742_v8  }
 0x302   : > { %v744_v21 = vmul.f32 1.442695, %v743_v11 }
 0x304   : > { %1269 = vpow2.f32 %v744_v21 }
 0x307   : > { %v844_v13 = vld [vmem:[#allocation2] sm:$0xff] }
 0x308   : > { %v774_v14 = vpop.permute.xlu1 %773  ;;  %v848_v15 = vmax.f32 %v844_v13, %v847_v10  ;;  %1256 = vset.pattern.permute.xlu0 %v1319_v5 }
 0x309   : > { %v779_v22 = vsel %vm548_vm4, %v774_v14, 0 }
 0x30a   : > { %854 = vperm.xlu2 %1252, %v848_v15   ;;  %v849_v16 = vsub.f32 %v844_v13, %v848_v15  ;;  %899 = vst.msk [vmem:[#allocation2] sm:$0xff] %vm866_vm8, %v848_v15  ;;  %v1270_v23 = vpop.eup %1269  ;;  %886 = vmatpush.bf16.msrb.mxu2 %v779_v22 }
 0x30b   : > { %788 = vmatpush.bf16.msrb.mxu3 %v779_v22 }
 0x30c   : > { %v850_v35 = vmul.f32 1.442695, %v849_v16 }
 0x310   : > { %v541_v18 = vpop.permute.xlu1 %540 }
 0x311   : > { %v543_v19 = vmul.f32 %v541_v18, %v537_v17 }
 0x312   : > { %1255 = vset.pattern.permute.xlu2 %v1318_v4 }
 0x313   : > { %v565_v20 = vadd.f32 %v561_v45, %v543_v19 }
 0x315   : > { %566 = vst.msk [vmem:[#allocation4] sm:$0xff] %vm492_vm1, %v565_v20 }
 0x319   : > { %v639_v48 = vpop.permute.xlu1 %638 }
 0x31c   : > { %v635_v49 = vld [vmem:[#allocation4] sm:$0xff] }
 0x31d   : > { %v641_v50 = vmul.f32 %v639_v48, %v635_v49 }
 0x32a   : > { %630 = vadd.xlane.f32.xlu0 %v629_v9 }
 0x333   : > { %532 = vadd.xlane.f32.xlu2 %v531_v12 }
 0x34b   : > { %765 = vperm.xlu2 %1255, %v1270_v23  }
 0x34c   : > { %v655_v24 = vpop.f32.mrf.mxu3 }
 0x34d   : > { %660 = vrot.lane.b32.xlu1 %v655_v24, %s1308_s19 }
 0x353   : > { %1258 = vset.pattern.permute.xlu2 %v1317_v41  ;;  %v530_v41 = vmul.f32 %v1493_v61, %v529_v40 }
 0x354   : > { %v657_v25 = vpop.f32.mrf.mxu3 }
 0x364   : > { %v855_v26 = vpop.permute.xlu2 %854 }
 0x365   : > { %v857_v27 = vsub.f32 %v1480_v47, %v855_v26 }
 0x367   : > { %v858_v28 = vmul.f32 1.442695, %v857_v27 }
 0x369   : > { %1271 = vpow2.f32 %v858_v28 }
 0x36f   : > { %v1272_v29 = vpop.eup %1271 }
 0x370   : > { %v862_v30 = vsel %vm492_vm1, %v1272_v29, 0.0  ;;  %v875_v31 = vpack.c.bf16 %v1272_v29, %v1272_v29 }
 0x371   : > { %863 = vadd.xlane.f32.xlu0 %v862_v30 }
 0x372   : > { %v749_v32 = vpop.permute.xlu0 %748  ;;  %1195 = vmatmul.msk.bf16.vlgmr.msrb.gmra.mxu2 %vm492_vm1, %v875_v31 }
 0x373   : > { %v751_v33 = vsub.f32 %v1487_v52, %v749_v32 }
 0x375   : > { %v752_v34 = vmul.f32 1.442695, %v751_v33 }
 0x377   : > { %1273 = vpow2.f32 %v752_v34 }
 0x378   : > { %1275 = vpow2.f32 %v850_v35 }
 0x37d   : > { %v1274_v36 = vpop.eup %1273 }
 0x37e   : > { %v756_v37 = vsel %vm492_vm1, %v1274_v36, 0.0  ;;  %v769_v38 = vpack.c.bf16 %v1274_v36, %v1274_v36  ;;  %v1276_v39 = vpop.eup %1275 }
 0x37f   : > { %757 = vadd.xlane.f32.xlu1 %v756_v37 }
 0x380   : > { %1193 = vmatmul.msk.bf16.vlgmr.msrb.gmra.mxu3 %vm492_vm1, %v769_v38  ;;  %vm953_vm1 = vcmask 126016  }
 0x385   : > { %871 = vperm.xlu0 %1256, %v1276_v39  }
 0x39d   : > { %v631_v46 = vpop.xlane.xlu0 %630 }
 0x3a6   : > { %v533_v42 = vpop.xlane.xlu2 %532 }
 0x3a7   : > { %v534_v43 = vadd.f32 %v533_v42, %v530_v41 }
 0x3a9   : > { %536 = vst.msk [vmem:[#allocation3] sm:$0xff] %vm535_vm3, %v534_v43  ;;  %vm1005_vm3 = vcmask 257216  }
 0x3ae   : > { %v766_v16 = vpop.permute.xlu2 %765 }
 0x3b0   : > { %v627_v44 = vld [vmem:[#allocation3] sm:$0xff] }
 0x3b1   : > { %v628_v45 = vmul.f32 %v1496_v62, %v627_v44 }
 0x3b3   : > { %v632_v47 = vadd.f32 %v631_v46, %v628_v45 }
 0x3b5   : > { %634 = vst.msk [vmem:[#allocation3] sm:$0xff] %vm633_vm5, %v632_v47 }
 0x3bc   : > { %v754_v53 = vld [vmem:[#allocation3] sm:$0xff] }
 0x3bd   : > { %v755_v54 = vmul.f32 %v1270_v23, %v754_v53 }
 0x3bf   : > { %v661_v51 = vpop.permute.xlu1 %660 }
 0x3c0   : > { %v663_v52 = vadd.f32 %v661_v51, %v641_v50 }
 0x3c2   : > { %665 = vst.msk [vmem:[#allocation4] sm:$0xff] %vm664_vm9, %v663_v52 }
 0x3c9   : > { %v762_v17 = vld [vmem:[#allocation4] sm:$0xff] }
 0x3ca   : > { %v768_v18 = vmul.f32 %v766_v16, %v762_v17 }
 0x3e4   : > { %v864_v61 = vpop.xlane.xlu0 %863 }
 0x3f2   : > { %v758_v55 = vpop.xlane.xlu1 %757 }
 0x3f3   : > { %v759_v56 = vadd.f32 %v758_v55, %v755_v54 }
 0x3f5   : > { %761 = vst.msk [vmem:[#allocation3] sm:$0xff] %vm760_vm7, %v759_v56  ;;  %v888_v57 = vpop.f32.mrf.mxu2 }
 0x3f7   : > { %v872_v9 = vpop.permute.xlu0 %871 }
 0x3fc   : > { %v860_v58 = vld [vmem:[#allocation3] sm:$0xff] }
 0x3fd   : > { %v861_v59 = vmul.f32 %v1276_v39, %v860_v58  ;;  %v890_v60 = vpop.f32.mrf.mxu2 }
 0x3ff   : > { %v865_v62 = vadd.f32 %v864_v61, %v861_v59 }
 0x401   : > { %867 = vst.msk [vmem:[#allocation3] sm:$0xff] %vm866_vm8, %v865_v62 }
 0x403   : > { %v790_v63 = vpop.f32.mrf.mxu3 }
 0x404   : > { %795 = vrot.lane.b32.xlu2 %v790_v63, %s1309_s24 }
 0x408   : > { %v929_v0 = vld [vmem:[#allocation3] sm:$0xff] }
 0x409   : > { %1277 = vrcp.f32 %v929_v0  ;;  %v941_v7 = vand.u32 2147483648, %v929_v0  ;;  %v939_v10 = vand.u32 2147483647, %v929_v0  ;;  %vm935_vm11 = vweird.f32 %v929_v0 }
 0x40b   : > { %v792_v1 = vpop.f32.mrf.mxu3  ;;  %v942_v13 = vor.u32 1.1754944e-38, %v941_v7  ;;  %vm940_vm13 = vcmp.eq.f32.partialorder %v939_v10, 8.507059e+37 }
 0x40c   : > { %893 = vrot.lane.b32.xlu2 %v888_v57, %s1310_s29 }
 0x40f   : > { %v1278_v2 = vpop.eup %1277 }
 0x410   : > { %v931_v3 = vmul.f32 %v1278_v2, %v929_v0  ;;  %vm936_vm10 = vweird.f32 %v1278_v2 }
 0x411   : > { %vm937_vm12 = vmor %vm935_vm11, %vm936_vm10 }
 0x412   : > { %v932_v6 = vsub.f32 1.0, %v931_v3 }
 0x414   : > { %v933_v8 = vmul.f32 %v1278_v2, %v932_v6 }
 0x416   : > { %v934_v11 = vadd.f32 %v1278_v2, %v933_v8 }
 0x418   : > { %v938_v14 = vsel %vm937_vm12, %v1278_v2, %v934_v11 }
 0x419   : > { %v943_v15 = vsel %vm940_vm13, %v942_v13, %v938_v14 }
 0x41a   : > { %948 = vperm.xlu2 %1258, %v943_v15   ;;  %922 = vperm.xlu1 %1257, %v943_v15  }
 0x422   : > { %1259 = vset.pattern.permute.xlu2 %v1318_v4 }
 0x423   : > { %974 = vperm.xlu2 %1259, %v943_v15  }
 0x42b   : > { %1260 = vset.pattern.permute.xlu2 %v1319_v5 }
 0x42c   : > { %1000 = vperm.xlu2 %1260, %v943_v15  }
 0x45e   : > { %v796_v19 = vpop.permute.xlu2 %795 }
 0x45f   : > { %v798_v20 = vadd.f32 %v796_v19, %v768_v18 }
 0x461   : > { %800 = vst.msk [vmem:[#allocation4] sm:$0xff] %vm799_vm14, %v798_v20 }
 0x466   : > { %v894_v22 = vpop.permute.xlu2 %893 }
 0x468   : > { %v868_v12 = vld [vmem:[#allocation4] sm:$0xff] }
 0x469   : > { %v874_v21 = vmul.f32 %v872_v9, %v868_v12 }
 0x46b   : > { %v896_v23 = vadd.f32 %v894_v22, %v874_v21 }
 0x46d   : > { %898 = vst.msk [vmem:[#allocation4] sm:$0xff] %vm897_vm15, %v896_v23 }
 0x474   : > { %v949_v4 = vpop.permute.xlu2 %948  ;;  %v945_v25 = vld [vmem:[#allocation4] sm:$0xff] }
 0x475   : > { %v951_v26 = vmul.f32 %v949_v4, %v945_v25 }
 0x477   : > { %v952_v32 = vpack.c.bf16 %v951_v26, %v951_v26 }
 0x47d   : > { %v975_v24 = vpop.permute.xlu2 %974 }
 0x47e   : > { %v977_v28 = vmul.f32 %v975_v24, %v945_v25 }
 0x480   : > { %v978_v33 = vpack.c.bf16 %v977_v28, %v977_v28 }
 0x486   : > { %v1001_v5 = vpop.permute.xlu2 %1000 }
 0x487   : > { %v1003_v30 = vmul.f32 %v1001_v5, %v945_v25 }
 0x489   : > { %v1004_v34 = vpack.c.bf16 %v1003_v30, %v1003_v30 }
 0x48c   : > { %v923_v27 = vpop.permute.xlu1 %922 }
 0x48d   : > { %v925_v29 = vmul.f32 %v945_v25, %v923_v27 }
 0x48f   : > { %v926_v31 = vpack.c.bf16 %v925_v29, %v925_v29 }
 0x491   : > { %928 = vst.msk [vmem:[%s435_s17] sm:$0xf] %vm927_vm0, %v926_v31 }
 0x492   : > { %954 = vst.msk [vmem:[%s435_s17] sm:$0xf] %vm953_vm1, %v952_v32 }
 0x493   : > { %980 = vst.msk [vmem:[%s435_s17] sm:$0xf] %vm979_vm2, %v978_v33 }
 0x494   : > { %1006 = vst.msk [vmem:[%s435_s17] sm:$0xf] %vm1005_vm3, %v1004_v34 }
 0x495 PF: > { %s17_s26 = sadd.s32 1, %s1301_s26   ;;  %s1553_s24 = smov %s1297_s25 }
 0x496   : > { %p14_p5 = scmp.ge.s32.totalorder %s17_s26, 4   ;;  %s1554_s25 = smov %s1556_s27 }
 0x498   :  { %16 = sbr.rel (!%p14_p5) target bundleno = 2 (0x2), region = 104 }

// kernel: transformer_forward.15
= control target key start
LH: loop header
LB: loop body
LE: loop exit
PB: predicated region body
PF: predicated region fallthrough
CT: control target
= control target key end

     0   :  { %vm19_vm0 = vcmask 261120   ;;  %v154_v1 = vmov 0.0   ;;  %vm79_vm1 = vcmask 785408   ;;  %s214_s1 = inlined_call_operand.vmem [shape: bf16[96,32], index: 1, kind: input, shape index: {}]   ;;  %s215_s0 = inlined_call_operand.vmem [shape: bf16[16,96], index: 0, kind: input, shape index: {}]   ;;  %s216_s2 = inlined_call_operand.vmem [shape: f32[16,32], index: 2, kind: input, shape index: {}]   ;;  %s217_s3 = inlined_call_operand.vmem [shape: f32[16,32], index: 3, kind: output, shape index: {}]  }
   0x1   :  { %v152_v0 = vld [vmem:[%s214_s1 + $0x28] sm:$0xff]  ;;  %20 = vst.msk [vmem:[#allocation2] sm:$0xff] %vm19_vm0, %v154_v1  ;;  %v151_v2 = vld [vmem:[%s214_s1 + $0x20] sm:$0xff]  ;;  %v150_v3 = vld [vmem:[%s214_s1 + $0x18] sm:$0xff] }
   0x2   :  { %21 = vst.msk [vmem:[#allocation2 + $0x8] sm:$0xff] %vm19_vm0, %v154_v1  ;;  %85 = vmatpush.bf16.msra.mxu0 %v152_v0  ;;  %v149_v4 = vld [vmem:[%s214_s1 + $0x10] sm:$0xff]  ;;  %v148_v5 = vld [vmem:[%s214_s1 + $0x8] sm:$0xff]  ;;  %v147_v6 = vld [vmem:[%s214_s1] sm:$0xff] }
   0x3   :  { %v146_v7 = vld [vmem:[%s215_s0] sm:$0xff]  ;;  %v108_v17 = vld [vmem:[%s216_s2 + $0x8] sm:$0xff] }
   0x4   :  { %v107_v12 = vld [vmem:[%s216_s2] sm:$0xff] }
   0x6   :  { %86 = vmatpush.bf16.msra.mxu0 %v151_v2 }
   0x8   :  { %v22_v8 = vld [vmem:[#allocation2] sm:$0xff] }
   0x9   :  { %v23_v11 = vld [vmem:[#allocation2 + $0x8] sm:$0xff] }
   0xa   :  { %87 = vmatpush.bf16.msra.mxu0 %v150_v3 }
   0xe   :  { %88 = vmatpush.bf16.msra.mxu0 %v149_v4 }
  0x12   :  { %89 = vmatpush.bf16.msra.mxu0 %v148_v5 }
  0x16   :  { %90 = vmatpush.bf16.msra.mxu0 %v147_v6 }
  0x19   :  { %145 = vmatmul.msk.bf16.vlgmr.msra.gmra.mxu0 %vm79_vm1, %v146_v7 }
  0x96   :  { %v92_v9 = vpop.f32.mrf.mxu0 }
  0x97   :  { %v97_v10 = vadd.f32 %v92_v9, %v22_v8 }
  0x99   :  { %100 = vst.msk [vmem:[#allocation2] sm:$0xff] %vm19_vm0, %v97_v10 }
  0x9e   :  { %v94_v13 = vpop.f32.mrf.mxu0 }
  0x9f   :  { %v98_v14 = vadd.f32 %v94_v13, %v23_v11 }
  0xa0   :  { %v105_v15 = vld [vmem:[#allocation2] sm:$0xff] }
  0xa1   :  { %v109_v16 = vadd.f32 %v107_v12, %v105_v15  ;;  %101 = vst.msk [vmem:[#allocation2 + $0x8] sm:$0xff] %vm19_vm0, %v98_v14 }
  0xa3   :  { %111 = vst.msk [vmem:[%s217_s3] sm:$0xff] %vm19_vm0, %v109_v16 }
  0xa8   :  { %v106_v18 = vld [vmem:[#allocation2 + $0x8] sm:$0xff] }
  0xa9   :  { %v110_v19 = vadd.f32 %v108_v17, %v106_v18 }
  0xab   :  { %112 = vst.msk [vmem:[%s217_s3 + $0x8] sm:$0xff] %vm19_vm0, %v110_v19 }

// kernel: transformer_forward.21
= control target key start
LH: loop header
LB: loop body
LE: loop exit
PB: predicated region body
PF: predicated region fallthrough
CT: control target
= control target key end

     0   :  { %vm16_vm0 = vcmask 261120   ;;  %s154_s0 = inlined_call_operand.vmem [shape: f32[16,32], index: 0, kind: input, shape index: {}]   ;;  %s155_s1 = inlined_call_operand.vmem [shape: f32[1,32], index: 1, kind: input, shape index: {}]   ;;  %s156_s2 = inlined_call_operand.hbm [shape: f32[16,32], index: 2, kind: output, shape index: {}]  }
   0x1   :  { %v12_v0 = vld [vmem:[%s154_s0] sm:$0xff] }
   0x2   :  { %v14_v1 = vmul.f32 %v12_v0, %v12_v0 }
   0x3   :  { %7 = vsyncpa [#allocation3], 0  ;;  %v13_v2 = vld [vmem:[%s154_s0 + $0x8] sm:$0xff]  ;;  %v119_v6 = vmov 32.0   ;;  %v86_v27 = vld [vmem:[%s155_s1] ss:$0 sm:$0xff] }
   0x4   :  { %v17_v3 = vsel %vm16_vm0, %v14_v1, 0.0  ;;  %v15_v4 = vmul.f32 %v13_v2, %v13_v2  ;;  %87 = vrcp.f32 %v119_v6  ;;  %s120_s14 = smov [#allocation2]   ;;  %s70_s18 = sshll.u32 %s156_s2, 4  ;;  %s71_s18 = int_to_ptr.hbm [resolvable:$true] %s70_s18 }
   0x5   :  { %18 = vadd.xlane.f32.xlu0 %v17_v3  ;;  %s68_s15 = sshll.u32 %s120_s14, 4  ;;  %s121_s1 = smov 128   ;;  %s69_s15 = int_to_ptr.vmem [resolvable:$true] %s68_s15 }
   0x6   :  { %v20_v5 = vsel %vm16_vm0, %v15_v4, 0.0  ;;  %s122_s19 = smov 8  }
   0xa   :  { %v88_v7 = vpop.eup %87 }
   0xb   :  { %v24_v8 = vmul.f32 32.0, %v88_v7  ;;  %vm28_vm1 = vweird.f32 %v88_v7 }
   0xd   :  { %21 = vadd.xlane.f32.xlu0 %v20_v5  ;;  %v25_v9 = vsub.f32 1.0, %v24_v8 }
   0xf   :  { %v26_v10 = vmul.f32 %v88_v7, %v25_v9 }
  0x11   :  { %v27_v11 = vadd.f32 %v88_v7, %v26_v10 }
  0x13   :  { %v29_v12 = vsel %vm28_vm1, %v88_v7, %v27_v11 }
  0x78   :  { %v19_v13 = vpop.xlane.xlu0 %18 }
  0x79   :  { %v30_v14 = vmul.f32 %v29_v12, %v19_v13 }
  0x7b   :  { %v32_v15 = vadd.f32 1e-05, %v30_v14 }
  0x7d   :  { %89 = vrsqrt.f32 %v32_v15  ;;  %vm40_vm3 = vweird.f32 %v32_v15 }
  0x80   :  { %v22_v16 = vpop.xlane.xlu0 %21 }
  0x81   :  { %v31_v17 = vmul.f32 %v29_v12, %v22_v16 }
  0x83   :  { %v90_v18 = vpop.eup %89  ;;  %v33_v19 = vadd.f32 1e-05, %v31_v17 }
  0x84   :  { %v35_v20 = vmul.f32 %v90_v18, %v32_v15  ;;  %vm41_vm2 = vweird.f32 %v90_v18 }
  0x85   :  { %91 = vrsqrt.f32 %v33_v19  ;;  %vm42_vm4 = vmor %vm40_vm3, %vm41_vm2  ;;  %vm50_vm6 = vweird.f32 %v33_v19 }
  0x86   :  { %v36_v21 = vmul.f32 %v90_v18, %v35_v20 }
  0x88   :  { %v37_v22 = vmul.f32 0.5, %v36_v21 }
  0x8a   :  { %v38_v23 = vsub.f32 1.5, %v37_v22 }
  0x8b   :  { %v92_v24 = vpop.eup %91 }
  0x8c   :  { %v39_v25 = vmul.f32 %v90_v18, %v38_v23  ;;  %v45_v26 = vmul.f32 %v92_v24, %v33_v19  ;;  %vm51_vm5 = vweird.f32 %v92_v24 }
  0x8d   :  { %vm52_vm7 = vmor %vm50_vm6, %vm51_vm5 }
  0x8e   :  { %v43_v28 = vsel %vm42_vm4, %v90_v18, %v39_v25  ;;  %v46_v29 = vmul.f32 %v92_v24, %v45_v26 }
  0x8f   :  { %v54_v30 = vmul.f32 %v43_v28, %v12_v0 }
  0x90   :  { %v47_v31 = vmul.f32 0.5, %v46_v29 }
  0x91   :  { %v60_v32 = vmul.f32 %v86_v27, %v54_v30 }
  0x92   :  { %v48_v33 = vsub.f32 1.5, %v47_v31 }
  0x93   :  { %62 = vst.msk [vmem:[#allocation2] sm:$0xff] %vm16_vm0, %v60_v32 }
  0x94   :  { %v49_v34 = vmul.f32 %v92_v24, %v48_v33 }
  0x96   :  { %v53_v35 = vsel %vm52_vm7, %v92_v24, %v49_v34 }
  0x97   :  { %v55_v36 = vmul.f32 %v53_v35, %v13_v2 }
  0x99   :  { %v61_v37 = vmul.f32 %v86_v27, %v55_v36 }
  0x9b   :  { %63 = vst.msk [vmem:[#allocation2 + $0x8] sm:$0xff] %vm16_vm0, %v61_v37 }
  0x9c   :  { %76 = dma.vmem_to_hbm [thread:$0]  %s69_s15, 256, %s71_s18, [#allocation3], %s121_s1, %s121_s1, %s122_s19  }
  0x9d   :  { %117 = dma.done.wait [#allocation3], 256  }
  0x9e   :  { %118 = vsyncadd [#allocation3], 4294967040 }
  0x9f   :  { %81 = vsyncpa [#allocation3], 1 }

// kernel: transformer_forward.16
= control target key start
LH: loop header
LB: loop body
LE: loop exit
PB: predicated region body
PF: predicated region fallthrough
CT: control target
= control target key end

     0   :  { %vm23_vm0 = vcmask 261120   ;;  %v148_v6 = vmov 32.0   ;;  %vm71_vm5 = vcmask 257024   ;;  %vm117_vm9 = vcmask 519168   ;;  %s193_s0 = inlined_call_operand.vmem [shape: f32[16,32], index: 0, kind: input, shape index: {}]   ;;  %s194_s1 = inlined_call_operand.vmem [shape: f32[1,32], index: 1, kind: input, shape index: {}]   ;;  %s195_s2 = inlined_call_operand.vmem [shape: bf16[32,64], index: 2, kind: input, shape index: {}]   ;;  %s196_s3 = inlined_call_operand.vmem [shape: bf16[16,64], index: 3, kind: output, shape index: {}]  }
   0x1   :  { %v19_v0 = vld [vmem:[%s193_s0] sm:$0xff]  ;;  %v20_v2 = vld [vmem:[%s193_s0 + $0x8] sm:$0xff]  ;;  %142 = vrcp.f32 %v148_v6 }
   0x2   :  { %v21_v1 = vmul.f32 %v19_v0, %v19_v0  ;;  %v22_v4 = vmul.f32 %v20_v2, %v20_v2  ;;  %v139_v16 = vld [vmem:[%s195_s2 + $0x8] sm:$0xff]  ;;  %v138_v17 = vld [vmem:[%s195_s2] sm:$0xff] }
   0x3   :  { %107 = vmatpush.bf16.msra.mxu0 %v139_v16  ;;  %v141_v29 = vld [vmem:[%s194_s1] ss:$0 sm:$0xff] }
   0x4   :  { %v24_v3 = vsel %vm23_vm0, %v21_v1, 0.0  ;;  %v27_v5 = vsel %vm23_vm0, %v22_v4, 0.0 }
   0x5   :  { %25 = vadd.xlane.f32.xlu0 %v24_v3 }
   0x7   :  { %v143_v7 = vpop.eup %142  ;;  %108 = vmatpush.bf16.msra.mxu0 %v138_v17 }
   0x8   :  { %v31_v8 = vmul.f32 32.0, %v143_v7  ;;  %vm35_vm1 = vweird.f32 %v143_v7 }
   0xa   :  { %v32_v9 = vsub.f32 1.0, %v31_v8 }
   0xc   :  { %v33_v10 = vmul.f32 %v143_v7, %v32_v9 }
   0xd   :  { %28 = vadd.xlane.f32.xlu0 %v27_v5 }
   0xe   :  { %v34_v11 = vadd.f32 %v143_v7, %v33_v10 }
  0x10   :  { %v36_v12 = vsel %vm35_vm1, %v143_v7, %v34_v11 }
  0x78   :  { %v26_v13 = vpop.xlane.xlu0 %25 }
  0x79   :  { %v37_v14 = vmul.f32 %v36_v12, %v26_v13 }
  0x7b   :  { %v39_v15 = vadd.f32 1e-05, %v37_v14 }
  0x7d   :  { %144 = vrsqrt.f32 %v39_v15  ;;  %vm47_vm3 = vweird.f32 %v39_v15 }
  0x80   :  { %v29_v18 = vpop.xlane.xlu0 %28 }
  0x81   :  { %v38_v19 = vmul.f32 %v36_v12, %v29_v18 }
  0x83   :  { %v145_v20 = vpop.eup %144  ;;  %v40_v21 = vadd.f32 1e-05, %v38_v19 }
  0x84   :  { %v42_v22 = vmul.f32 %v145_v20, %v39_v15  ;;  %vm48_vm2 = vweird.f32 %v145_v20 }
  0x85   :  { %146 = vrsqrt.f32 %v40_v21  ;;  %vm49_vm4 = vmor %vm47_vm3, %vm48_vm2  ;;  %vm57_vm7 = vweird.f32 %v40_v21 }
  0x86   :  { %v43_v23 = vmul.f32 %v145_v20, %v42_v22 }
  0x88   :  { %v44_v24 = vmul.f32 0.5, %v43_v23 }
  0x8a   :  { %v45_v25 = vsub.f32 1.5, %v44_v24 }
  0x8b   :  { %v147_v26 = vpop.eup %146 }
  0x8c   :  { %v46_v27 = vmul.f32 %v145_v20, %v45_v25  ;;  %v52_v28 = vmul.f32 %v147_v26, %v40_v21  ;;  %vm58_vm6 = vweird.f32 %v147_v26 }
  0x8d   :  { %vm59_vm8 = vmor %vm57_vm7, %vm58_vm6 }
  0x8e   :  { %v50_v30 = vsel %vm49_vm4, %v145_v20, %v46_v27  ;;  %v53_v31 = vmul.f32 %v147_v26, %v52_v28 }
  0x8f   :  { %v61_v32 = vmul.f32 %v50_v30, %v19_v0 }
  0x90   :  { %v54_v33 = vmul.f32 0.5, %v53_v31 }
  0x91   :  { %v67_v34 = vmul.f32 %v141_v29, %v61_v32 }
  0x92   :  { %v55_v35 = vsub.f32 1.5, %v54_v33 }
  0x93   :  { %v69_v36 = vpack.c.bf16 %v67_v34, %v67_v34 }
  0x94   :  { %v56_v37 = vmul.f32 %v147_v26, %v55_v35 }
  0x95   :  { %72 = vst.msk [vmem:[#allocation2] sm:$0xf] %vm71_vm5, %v69_v36 }
  0x96   :  { %v60_v38 = vsel %vm59_vm8, %v147_v26, %v56_v37 }
  0x97   :  { %v62_v39 = vmul.f32 %v60_v38, %v20_v2 }
  0x99   :  { %v68_v40 = vmul.f32 %v141_v29, %v62_v39 }
  0x9b   :  { %v70_v41 = vpack.c.bf16 %v68_v40, %v68_v40 }
  0x9d   :  { %73 = vst.msk [vmem:[#allocation2 + $0x4] sm:$0xf] %vm71_vm5, %v70_v41 }
  0xa4   :  { %v137_v42 = vld [vmem:[#allocation2] sm:$0xff] }
  0xa5   :  { %136 = vmatmul.msk.bf16.vlgmr.msra.gmra.mxu0 %vm23_vm0, %v137_v42 }
 0x122   :  { %v110_v43 = vpop.f32.mrf.mxu0 }
 0x123   :  { %v115_v44 = vpack.c.bf16 %v110_v43, %v110_v43 }
 0x125   :  { %118 = vst.msk [vmem:[%s196_s3] sm:$0xf] %vm117_vm9, %v115_v44 }
 0x12a   :  { %v112_v45 = vpop.f32.mrf.mxu0 }
 0x12b   :  { %v116_v46 = vpack.c.bf16 %v112_v45, %v112_v45 }
 0x12d   :  { %119 = vst.msk [vmem:[%s196_s3 + $0x4] sm:$0xf] %vm117_vm9, %v116_v46 }

</bundles_post_ra>
